<compile_context>
chip_gen: v7x
topology: tpu7x:2x2x1
jax: 0.10.0
libtpu: 0.0.40
codegen_flags: <defaults>
</compile_context>

<pallas_src>
import functools

import jax
import jax.numpy as jnp
from jax import lax
from jax.experimental import pallas as pl
from jax.experimental.pallas import tpu as pltpu


def _qkv_mm_kernel(x_ref, w_ref, b_ref, o_ref, *, hw):
    # x_ref: ((T+2)*HW, 9C)   spatial-im2col'd, causally padded volume
    #                         (one batch element, resident across T-tiles)
    # w_ref: (3, 9C, COUT_P)  per-temporal-tap packed weights (lane-padded Cout)
    # b_ref: (1, COUT_P)      f32 bias (lane-padded)
    # o_ref: (TILE_M, COUT_P) with TILE_M = TILE_T * HW
    tile_m, _ = o_ref.shape
    base = pl.program_id(1) * tile_m           # first output row of this T-tile

    acc = None
    for kt in range(3):                        # causal temporal taps t, t+1, t+2
        # Row window of the im2col slab for temporal tap kt; start is always a
        # multiple of HW (hence sublane aligned when HW % 8 == 0).
        start = pl.multiple_of(base + kt * hw, hw)
        lhs = x_ref[pl.ds(start, tile_m), :]                     # (TILE_M, 9C)
        part = jnp.dot(lhs, w_ref[kt], preferred_element_type=jnp.float32)
        acc = part if acc is None else acc + part

    # Single lane-dense (COUT_P % 128 == 0) store; bias added once.
    o_ref[...] = (acc + b_ref[...]).astype(o_ref.dtype)


def _pick_tile_t(T, HW, K9, cout_p, in_itemsize, out_itemsize,
                 vmem_budget, max_tile_t=None):
    """Largest T-tile (divisor of T) whose working set fits the VMEM budget.

    Returns (tile_t, estimated_vmem_bytes_for_that_tile).
    """
    divisors = [d for d in range(1, T + 1) if T % d == 0]
    # (8,128) rule: out-block sublane dim (TILE_T*HW) must be a multiple of 8
    # unless the block spans the full output rows (TILE_T == T).
    valid = [d for d in divisors if d == T or (d * HW) % 8 == 0]
    if max_tile_t is not None:
        capped = [d for d in valid if d <= max_tile_t]
        if capped:
            valid = capped

    fixed = (2 * (T + 2) * HW * K9 * in_itemsize   # resident im2col slab (2 bufs)
             + 2 * 3 * K9 * cout_p * in_itemsize   # packed weights (2 bufs)
             + 2 * 2 * cout_p * 4)                 # bias

    def need(tt):
        m = tt * HW
        return (fixed
                + 2 * m * cout_p * out_itemsize    # double-buffered out tile
                + m * cout_p * 4                   # f32 accumulator temp
                + m * K9 * in_itemsize)            # LHS row-window temp

    fitting = [d for d in valid if need(d) <= vmem_budget]
    best = max(fitting) if fitting else min(valid)
    return best, need(best)


def qkv_net_forward(x_ncdhw, weight_dhwio, bias, *, max_tile_t=None,
                    compute_dtype=None):
    """QKVNet.forward.

    x_ncdhw:       (N, C, T, H, W)   PyTorch layout
    weight_dhwio:  (3, 3, 3, C, 3C)  conv weight in (kt, kh, kw, Cin, Cout) order
    bias:          (3C,)
    compute_dtype: optional MXU operand dtype (e.g. jnp.bfloat16 on v6e/v7x);
                   accumulation is always f32.
    returns        (N, 3C, T, H, W)
    """
    N, C, T, H, W = x_ncdhw.shape
    Cout = weight_dhwio.shape[-1]
    cout_p = ((Cout + 127) // 128) * 128          # lane-dense output channels
    HW = H * W
    K9 = 9 * C
    op_dtype = (jnp.dtype(compute_dtype) if compute_dtype is not None
                else jnp.dtype(x_ncdhw.dtype))
    out_dtype = x_ncdhw.dtype

    # ---- wrapper-side layout / im2col (XLA) --------------------------------
    # NCDHW -> NTHWC; causal temporal pad (front-only) + symmetric H/W pad.
    # Only the 2 leading frames of PyTorch's pad=(2,2) survive the [:-2] slice.
    x = jnp.transpose(x_ncdhw, (0, 2, 3, 4, 1))                    # (N,T,H,W,C)
    xp = jnp.pad(x, ((0, 0), (2, 0), (1, 1), (1, 1), (0, 0)))      # (N,T+2,H+2,W+2,C)
    # 3x3 spatial im2col: channel order (kh, kw, c) matches the weight reshape.
    cols = [xp[:, :, kh:kh + H, kw:kw + W, :]
            for kh in range(3) for kw in range(3)]
    xim = jnp.concatenate(cols, axis=-1)                           # (N,T+2,H,W,9C)
    xim = xim.reshape(N, (T + 2) * HW, K9).astype(op_dtype)
    # TODO(synk): with allow_input_fusion / a fused producer the transpose +
    # pad + im2col could skip one HBM round trip of the expanded input.

    # (3,3,3,C,Cout) -> (3, 9C, cout_p): temporal-tap major, (kh,kw,c) rows,
    # zero-padded output channels so the kernel's lane dim is 128-dense.
    w2 = jnp.pad(weight_dhwio.reshape(3, K9, Cout),
                 ((0, 0), (0, 0), (0, cout_p - Cout))).astype(op_dtype)
    b2 = jnp.pad(bias.astype(jnp.float32).reshape(1, Cout),
                 ((0, 0), (0, cout_p - Cout)))

    # ---- tiling / VMEM budget (generation-aware) ----------------------------
    try:
        vmem_cap = int(pltpu.get_tpu_info().vmem_capacity_bytes)
    except Exception:                                   # pragma: no cover
        vmem_cap = 128 * 1024 * 1024
    vmem_limit = max(16 << 20, min(vmem_cap // 2, 96 << 20))

    in_item = jnp.dtype(op_dtype).itemsize
    out_item = jnp.dtype(out_dtype).itemsize
    tile_t, need_bytes = _pick_tile_t(
        T, HW, K9, cout_p, in_item, out_item,
        vmem_budget=int(vmem_limit * 0.8), max_tile_t=max_tile_t)
    if need_bytes > vmem_limit:      # smallest legal tile still exceeds budget:
        vmem_limit = need_bytes + (4 << 20)   # raise the limit, don't fail
    num_t = T // tile_t
    tile_m = tile_t * HW
    # TODO(synk): for volumes whose resident (T+2)*HW*9C slab exceeds ~1/4 of
    # v7x's 64 MiB VMEM, switch the x input to memory_space=pl.ANY with a
    # manually double-buffered (tile_t+2)-frame async-copy window.

    flops = 2 * N * T * HW * 3 * K9 * cout_p
    bytes_accessed = (N * (T + 2) * HW * K9 * in_item
                      + 3 * K9 * cout_p * in_item + cout_p * 4
                      + N * T * HW * cout_p * out_item)

    out = pl.pallas_call(
        functools.partial(_qkv_mm_kernel, hw=HW),
        out_shape=jax.ShapeDtypeStruct((N, T * HW, cout_p), out_dtype),
        grid_spec=pltpu.PrefetchScalarGridSpec(
            num_scalar_prefetch=0,
            grid=(N, num_t),
            in_specs=[
                # im2col slab: resident across all T-tiles of a batch element
                # (block index does not change with t -> no re-DMA).
                pl.BlockSpec((None, (T + 2) * HW, K9), lambda n, t: (n, 0, 0)),
                pl.BlockSpec((3, K9, cout_p), lambda n, t: (0, 0, 0)),
                pl.BlockSpec((1, cout_p), lambda n, t: (0, 0)),
            ],
            out_specs=pl.BlockSpec((None, tile_m, cout_p),
                                   lambda n, t: (n, t, 0)),
        ),
        compiler_params=pltpu.CompilerParams(
            dimension_semantics=("parallel", "parallel"),
            vmem_limit_bytes=int(vmem_limit)),
        cost_estimate=pl.CostEstimate(
            flops=flops, transcendentals=0, bytes_accessed=bytes_accessed),
    )(xim, w2, b2)

    # Drop channel padding, restore (N, Cout, T, H, W).
    # TODO(synk): if the consumer (QKV split + attention) can take the
    # channels-last (N, T*H*W, cout_p) layout, skip this transpose (it costs a
    # full extra HBM read+write of the largest tensor).
    out = out[:, :, :Cout].reshape(N, T, H, W, Cout)
    return jnp.transpose(out, (0, 4, 1, 2, 3))


def _reference(x_ncdhw, weight_dhwio, bias):
    # Pure-JAX reference with PyTorch Conv3d semantics.
    w_oidhw = jnp.transpose(weight_dhwio, (4, 3, 0, 1, 2))   # (Cout, Cin, 3,3,3)
    y = lax.conv_general_dilated(
        x_ncdhw, w_oidhw,
        window_strides=(1, 1, 1),
        padding=((2, 2), (1, 1), (1, 1)),
        dimension_numbers=("NCDHW", "OIDHW", "NCDHW"),
    )
    y = y + bias.reshape(1, -1, 1, 1, 1)
    return y[:, :, :-2]


if __name__ == "__main__":
    # Small shapes consistent with the module (default depth=32 -> 3*32 outputs).
    N, C, T, H, W = 2, 32, 8, 8, 8
    Cout = 3 * C

    key = jax.random.PRNGKey(0)
    kx, kw, kb = jax.random.split(key, 3)

    x = jax.random.normal(kx, (N, C, T, H, W), dtype=jnp.float32)

    # PyTorch-style init: U(-1/sqrt(fan_in), 1/sqrt(fan_in)), fan_in = C*3*3*3.
    bound = (C * 27) ** -0.5
    weight = jax.random.uniform(kw, (3, 3, 3, C, Cout), jnp.float32,
                                minval=-bound, maxval=bound)
    bias = jax.random.uniform(kb, (Cout,), jnp.float32,
                              minval=-bound, maxval=bound)

    fwd = jax.jit(qkv_net_forward, static_argnames=("max_tile_t", "compute_dtype"))
    # max_tile_t=4 forces a 2-way temporal tiling so the multi-tile path is
    # exercised; compute_dtype=jnp.bfloat16 is available for v6e/v7x throughput.
    out = jax.block_until_ready(fwd(x, weight, bias, max_tile_t=4))
    ref = jax.block_until_ready(_reference(x, weight, bias))

    assert out.shape == (N, Cout, T, H, W), out.shape
    max_err = float(jnp.max(jnp.abs(out - ref)))
    assert jnp.allclose(out, ref, atol=5e-4, rtol=5e-4), max_err
    print("KERNEL_OK")
</pallas_src>

<mosaic_0001>
module attributes {stable_mosaic.version = 11 : i64} {
  func.func @_qkv_mm_kernel(%arg0: i32, %arg1: i32, %arg2: memref<1x640x288xf32, #tpu.memory_space<vmem>>, %arg3: memref<3x288x128xf32, #tpu.memory_space<vmem>>, %arg4: memref<1x128xf32, #tpu.memory_space<vmem>>, %arg5: memref<1x256x128xf32, #tpu.memory_space<vmem>>) attributes {dimension_semantics = [#tpu.dimension_semantics<parallel>, #tpu.dimension_semantics<parallel>], iteration_bounds = array<i64: 2, 2>, scalar_prefetch = 0 : i64, scratch_operands = 0 : i64, tpu.core_type = #tpu.core_type<tc>, window_params = [{transform_indices = @transform_0, window_bounds = array<i64: 1, 640, 288>}, {pipeline_mode = #tpu.pipeline_mode<synchronous>, transform_indices = @transform_1, window_bounds = array<i64: 3, 288, 128>}, {pipeline_mode = #tpu.pipeline_mode<synchronous>, transform_indices = @transform_2, window_bounds = array<i64: 1, 128>}, {transform_indices = @transform_3, window_bounds = array<i64: 1, 256, 128>}]} {
    %c256_i32 = arith.constant 256 : i32
    %0 = arith.muli %arg1, %c256_i32 : i32
    %c0_i32 = arith.constant 0 : i32
    %1 = arith.addi %0, %c0_i32 : i32
    %2 = tpu.assume_multiple %1, 64 : i32
    %c0 = arith.constant 0 : index
    %3 = arith.index_cast %2 : i32 to index
    %c0_0 = arith.constant 0 : index
    %4 = vector.load %arg2[%c0, %3, %c0_0] : memref<1x640x288xf32, #tpu.memory_space<vmem>>, vector<1x256x288xf32>
    %5 = vector.shape_cast %4 : vector<1x256x288xf32> to vector<256x288xf32>
    %c0_1 = arith.constant 0 : index
    %c0_2 = arith.constant 0 : index
    %c0_3 = arith.constant 0 : index
    %6 = vector.load %arg3[%c0_1, %c0_2, %c0_3] : memref<3x288x128xf32, #tpu.memory_space<vmem>>, vector<1x288x128xf32>
    %7 = vector.shape_cast %6 : vector<1x288x128xf32> to vector<288x128xf32>
    %cst = arith.constant dense<0.000000e+00> : vector<256x128xf32>
    %8 = tpu.matmul %5, %7, %cst {dimension_numbers = #tpu.dot_dimension_numbers<[1], [0], [0], [1], [0, 0, 1, 1], [], []>} : vector<256x288xf32>, vector<288x128xf32>, vector<256x128xf32> -> vector<256x128xf32>
    %c64_i32 = arith.constant 64 : i32
    %9 = arith.addi %0, %c64_i32 : i32
    %10 = tpu.assume_multiple %9, 64 : i32
    %c0_4 = arith.constant 0 : index
    %11 = arith.index_cast %10 : i32 to index
    %c0_5 = arith.constant 0 : index
    %12 = vector.load %arg2[%c0_4, %11, %c0_5] : memref<1x640x288xf32, #tpu.memory_space<vmem>>, vector<1x256x288xf32>
    %13 = vector.shape_cast %12 : vector<1x256x288xf32> to vector<256x288xf32>
    %c1 = arith.constant 1 : index
    %c0_6 = arith.constant 0 : index
    %c0_7 = arith.constant 0 : index
    %14 = vector.load %arg3[%c1, %c0_6, %c0_7] : memref<3x288x128xf32, #tpu.memory_space<vmem>>, vector<1x288x128xf32>
    %15 = vector.shape_cast %14 : vector<1x288x128xf32> to vector<288x128xf32>
    %cst_8 = arith.constant dense<0.000000e+00> : vector<256x128xf32>
    %16 = tpu.matmul %13, %15, %cst_8 {dimension_numbers = #tpu.dot_dimension_numbers<[1], [0], [0], [1], [0, 0, 1, 1], [], []>} : vector<256x288xf32>, vector<288x128xf32>, vector<256x128xf32> -> vector<256x128xf32>
    %17 = arith.addf %8, %16 : vector<256x128xf32>
    %c128_i32 = arith.constant 128 : i32
    %18 = arith.addi %0, %c128_i32 : i32
    %19 = tpu.assume_multiple %18, 64 : i32
    %c0_9 = arith.constant 0 : index
    %20 = arith.index_cast %19 : i32 to index
    %c0_10 = arith.constant 0 : index
    %21 = vector.load %arg2[%c0_9, %20, %c0_10] : memref<1x640x288xf32, #tpu.memory_space<vmem>>, vector<1x256x288xf32>
    %22 = vector.shape_cast %21 : vector<1x256x288xf32> to vector<256x288xf32>
    %c2 = arith.constant 2 : index
    %c0_11 = arith.constant 0 : index
    %c0_12 = arith.constant 0 : index
    %23 = vector.load %arg3[%c2, %c0_11, %c0_12] : memref<3x288x128xf32, #tpu.memory_space<vmem>>, vector<1x288x128xf32>
    %24 = vector.shape_cast %23 : vector<1x288x128xf32> to vector<288x128xf32>
    %cst_13 = arith.constant dense<0.000000e+00> : vector<256x128xf32>
    %25 = tpu.matmul %22, %24, %cst_13 {dimension_numbers = #tpu.dot_dimension_numbers<[1], [0], [0], [1], [0, 0, 1, 1], [], []>} : vector<256x288xf32>, vector<288x128xf32>, vector<256x128xf32> -> vector<256x128xf32>
    %26 = arith.addf %17, %25 : vector<256x128xf32>
    %c0_14 = arith.constant 0 : index
    %c0_15 = arith.constant 0 : index
    %27 = vector.load %arg4[%c0_14, %c0_15] : memref<1x128xf32, #tpu.memory_space<vmem>>, vector<1x128xf32>
    %28 = vector.broadcast %27 : vector<1x128xf32> to vector<256x128xf32>
    %29 = arith.addf %26, %28 : vector<256x128xf32>
    %c0_16 = arith.constant 0 : index
    %c0_17 = arith.constant 0 : index
    %c0_18 = arith.constant 0 : index
    %30 = vector.load %arg5[%c0_16, %c0_17, %c0_18] : memref<1x256x128xf32, #tpu.memory_space<vmem>>, vector<1x256x128xf32>
    %31 = vector.shape_cast %30 : vector<1x256x128xf32> to vector<256x128xf32>
    %32 = vector.shape_cast %29 : vector<256x128xf32> to vector<1x256x128xf32>
    tpu.vector_store %arg5[%c0_16, %c0_17, %c0_18], %32 {strides = array<i32>} : memref<1x256x128xf32, #tpu.memory_space<vmem>>, vector<1x256x128xf32>,
    return
  }
  func.func @transform_0(%arg0: i32, %arg1: i32) -> (i32, i32, i32) {
    %c0_i32 = arith.constant 0 : i32
    %c0_i32_0 = arith.constant 0 : i32
    %c0_i32_1 = arith.constant 0 : i32
    return %arg0, %c0_i32, %c0_i32_0 : i32, i32, i32
  }
  func.func @transform_1(%arg0: i32, %arg1: i32) -> (i32, i32, i32) {
    %c0_i32 = arith.constant 0 : i32
    %c0_i32_0 = arith.constant 0 : i32
    %c0_i32_1 = arith.constant 0 : i32
    %c0_i32_2 = arith.constant 0 : i32
    return %c0_i32, %c0_i32_0, %c0_i32_1 : i32, i32, i32
  }
  func.func @transform_2(%arg0: i32, %arg1: i32) -> (i32, i32) {
    %c0_i32 = arith.constant 0 : i32
    %c0_i32_0 = arith.constant 0 : i32
    %c0_i32_1 = arith.constant 0 : i32
    return %c0_i32, %c0_i32_0 : i32, i32
  }
  func.func @transform_3(%arg0: i32, %arg1: i32) -> (i32, i32, i32) {
    %c0_i32 = arith.constant 0 : i32
    %c0_i32_0 = arith.constant 0 : i32
    return %arg0, %arg1, %c0_i32 : i32, i32, i32
  }
}

</mosaic_0001>

<bundles_post_ra>
// kernel: qkv_net_forward.1
= control target key start
LH: loop header
LB: loop body
LE: loop exit
PB: predicated region body
PF: predicated region fallthrough
CT: control target
= control target key end

     0   :  { %s4623_s0 = inlined_call_operand.hbm [shape: f32[2,640,288], index: 0, kind: input, shape index: {}]   ;;  %s4624_s1 = inlined_call_operand.hbm [shape: f32[3,288,128], index: 1, kind: input, shape index: {}]   ;;  %s4625_s2 = inlined_call_operand.hbm [shape: f32[1,128], index: 2, kind: input, shape index: {}]   ;;  %s4626_s3 = inlined_call_operand.hbm [shape: f32[2,512,128], index: 3, kind: output, shape index: {}]  }
   0x1   :  { %4636 = sst [smem:[#allocation16_spill]] %s4624_s1 }
   0x2   :  { %4637 = sst [smem:[#allocation17_spill]] %s4625_s2 }
   0x3   :  { %8 = vsyncpa [#allocation3], 0 }
   0x4   :  { %10 = vsyncpa [#allocation3 + $0x1], 0 }
   0x5   :  { %11 = vsyncpa [#allocation6], 0 }
   0x6   :  { %12 = vsyncpa [#allocation4], 0 }
   0x7   :  { %14 = vsyncpa [#allocation4 + $0x1], 0  ;;  %s3460_s12 = smov 0   ;;  %s3462_s13 = smov 0  }
   0x8   :  { %s3464_s14 = smov 0   ;;  %s3466_s15 = smov 0  }
   0x9   :  { %s3468_s16 = smov 0   ;;  %s3470_s17 = smov 0  }
   0xa   :  { %s3472_s18 = smov 0   ;;  %s3474_s19 = smov 0  }
   0xb   :  { %s3476_s20 = smov 0   ;;  %s3478_s21 = smov 0  }
   0xc   :  { %s3480_s22 = smov 0  }
   0xd LB: > { %4638 = sst [smem:[#allocation12_spill]] %s3387_s12  ;;  %s2517_s23 = sadd.s32 4294967295, %s3427_s22   ;;  %s3427_s22 = sphi %s3480_s22, %s20_s22   ;;  %s3423_s21 = sphi %s3478_s21, %s4669_s21   ;;  %s3419_s20 = sphi %s3476_s20, %s4661_s20   ;;  %s3415_s19 = sphi %s3474_s19, %s4668_s19   ;;  %s3411_s18 = sphi %s3472_s18, %s4660_s18   ;;  %s3407_s17 = sphi %s3470_s17, %s4667_s17   ;;  %s3403_s16 = sphi %s3468_s16, %s4666_s16   ;;  %s3399_s15 = sphi %s3466_s15, %s4665_s15   ;;  %s3395_s14 = sphi %s3464_s14, %s4664_s14   ;;  %s3391_s13 = sphi %s3462_s13, %s4663_s13   ;;  %s3387_s12 = sphi %s3460_s12, %s4662_s12  }
   0xe   : > { %4639 = sst [smem:[#allocation13_spill]] %s3419_s20  ;;  %s2518_s24 = sadd.s32 4294967294, %s3427_s22  }
   0xf   : > { %p52_p0 = scmp.ne.s32.totalorder %s3403_s16, %s3399_s15  ;;  %p3516_p1 = scmp.eq.s32.totalorder %s2517_s23, 0 }
  0x10   : > { %p119_p2 = scmp.ne.s32.totalorder %s3395_s14, %s3391_s13  ;;  %p120_p4 = scmp.eq.s32.totalorder %s2517_s23, 3 }
  0x11   : > { %s4640_s25 = scalar_select %p3516_p1, 1, 0 }
  0x12   : > { %p3525_p3 = por %p3516_p1, %p52_p0  ;;  %p125_p5 = scmp.ne.s32.totalorder %s3391_s13, %s3387_s12 }
  0x13   : > { %p126_p6 = scmp.eq.s32.totalorder %s2518_s24, 3  ;;  %p3531_p7 = por %p120_p4, %p119_p2 }
  0x14   : > { %s4641_s27 = scalar_select %p3525_p3, 1, 0 }
  0x15   : > { %s4642_s28 = scalar_select %p3531_p7, 1, 0 }
  0x16   : > { %p2519_p8 = scmp.ge.s32.totalorder %s3427_s22, 1  ;;  %p3536_p9 = por %p126_p6, %p125_p5 }
  0x17   : > { %p133_p10 = scmp.lt.s32.totalorder %s3427_s22, 5  ;;  %s3429_s4 = smov [#allocation5]  }
  0x18   : > { %s4643_s29 = scalar_select %p3536_p9, 1, 0 }
  0x19   : > { %p3541_p11 = pnand %p2519_p8, %p133_p10  ;;  %s145_s5 = sshll.u32 %s3429_s4, 4  ;;  %s146_s5 = int_to_ptr.vmem [resolvable:$true] %s145_s5 }
  0x1a   : > { %4644 = sst [smem:[#allocation14_spill]] %s4643_s29  ;;  %s3430_s7 = smov [#allocation7]  }
  0x1b   : > { %s4645_s30 = scalar_select %p3541_p11, 1, 0 }
  0x1c   : > { %p3097_p12 = pneg %p3541_p11  ;;  %s159_s8 = sshll.u32 %s3430_s7, 4  ;;  %s3553_s8 = int_to_ptr.vmem [resolvable:$true] %s159_s8 }
  0x1d   : > { %s4647_s1 = sld [smem:[#allocation16_spill]] }
  0x1e   : > { %p3549_p13 = pnand %p3097_p12, %p3516_p1 }
  0x20   : > { %p3217_p2 = pneg %p3549_p13 }
  0x23   : > { %s3215_s11 = scalar_lea.hbm %s4647_s1, 13824 }
  0x24   : > { %p3216_p0 = scmp.ne.s32.totalorder %s4647_s1, %s3215_s11  ;;  %p3222_p6 = scmp.lt.u32.totalorder %s3215_s11, %s4647_s1 }
  0x26   : > { %p3218_p4 = pnand %p3217_p2, %p3216_p0 }
  0x28   : > { %p3219_p5 = pneg %p3218_p4 }
  0x2a   : > { %p3224_p8 = pnand %p3222_p6, %p3219_p5 }
  0x2c   : > { %3227 = shalt.err (!%p3224_p8)
}
  0x2d   : > { %s3228_s7 = scalar_lea.vmem %s146_s5, 13824  ;;  %p3236_p7 = scmp.lt.s32.totalorder %s146_s5, %s146_s5 }
  0x2e   : > { %p3229_p10 = scmp.ne.s32.totalorder %s146_s5, %s3228_s7  ;;  %p3237_p1 = scmp.lt.s32.totalorder %s3228_s7, %s3228_s7 }
  0x30   : > { %p3231_p12 = pnand %p3229_p10, %p3217_p2  ;;  %p3238_p3 = por %p3237_p1, %p3236_p7 }
  0x32   : > { %p3232_p9 = pneg %p3231_p12 }
  0x34   : > { %p3239_p11 = pnand %p3238_p3, %p3232_p9 }
  0x36   : > { %3242 = shalt.err (!%p3239_p11)
}
  0x37   : > { %s3431_s9 = smov 128   ;;  %s3432_s10 = smov 8  }
  0x38   : > { %3100 = dma.hbm_to_vmem [thread:$0]  (!%p3549_p13), %s4647_s1, 13824, %s146_s5, [#allocation6], %s3431_s9, %s3431_s9, %s3432_s10  }
  0x39   : > { %s4648_s2 = sld [smem:[#allocation17_spill]] }
  0x3f   : > { %s3243_s4 = scalar_lea.hbm %s4648_s2, 16 }
  0x40   : > { %p3244_p0 = scmp.ne.s32.totalorder %s4648_s2, %s3243_s4  ;;  %p3250_p7 = scmp.lt.u32.totalorder %s3243_s4, %s4648_s2 }
  0x42   : > { %p3246_p1 = pnand %p3244_p0, %p3217_p2 }
  0x44   : > { %p3247_p3 = pneg %p3246_p1 }
  0x46   : > { %p3252_p9 = pnand %p3250_p7, %p3247_p3 }
  0x48   : > { %3255 = shalt.err (!%p3252_p9)
}
  0x49   : > { %s3256_s5 = scalar_lea.vmem %s3553_s8, 16  ;;  %s3263_s26 = scalar_lea.vmem %s3553_s8, 32 }
  0x4a   : > { %p3257_p11 = scmp.ne.s32.totalorder %s3553_s8, %s3256_s5  ;;  %p3264_p6 = scmp.lt.s32.totalorder %s3553_s8, %s3553_s8 }
  0x4b   : > { %p3265_p8 = scmp.lt.s32.totalorder %s3263_s26, %s3256_s5 }
  0x4c   : > { %p3259_p4 = pnand %p3257_p11, %p3217_p2 }
  0x4d   : > { %p3266_p10 = por %p3265_p8, %p3264_p6 }
  0x4e   : > { %p3260_p5 = pneg %p3259_p4 }
  0x50   : > { %p3267_p12 = pnand %p3266_p10, %p3260_p5 }
  0x52   : > { %3270 = shalt.err (!%p3267_p12)
}
  0x53   : > { %3103 = dma.hbm_to_vmem [thread:$0]  (!%p3549_p13), %s4648_s2, 16, %s3553_s8, [#allocation6]  }
  0x54   : > { %s29_s9 = sadd.s32 1, %s3419_s20  ;;  %s32_s10 = sadd.s32 1, %s3423_s21 }
  0x55   : > { %p30_p2 = scmp.ge.s32.totalorder %s29_s9, 2  ;;  %s39_s6 = sadd.s32 1, %s3407_s17 }
  0x56   : > { %p46_p0 = scmp.ne.s32.totalorder %s3407_s17, %s3403_s16  ;;  %p47_p1 = scmp.eq.s32.totalorder %s3427_s22, 0 }
  0x57   : > { %s4671_s9 = smov (%p30_p2, %s29_s9), 0  ;;  %s4673_s10 = smov (!%p30_p2, %s32_s10), %s3423_s21 }
  0x58   : > { %4649 = sst [smem:[#allocation15_spill]] %s4671_s9  ;;  %p3612_p3 = por %p47_p1, %p46_p0 }
  0x59   : > { %s105_s15 = ssub.s32 %s3419_s20, %s4671_s9  ;;  %p34_p13 = scmp.ge.s32.totalorder %s4673_s10, 2 }
  0x5a   : > { %p3114_p7 = scmp.lt.s32.totalorder %s3427_s22, 4  ;;  %s170_s8 = sand.u32 1, %s3407_s17  }
  0x5b   : > { %s3083_s23 = smul.u32 30720, %s3423_s21  ;;  %s4675_s10 = smov (%p34_p13, %s4673_s10), 0 }
  0x5c   : > { %s3082_s24 = smul.u32 1920, %s170_s8  ;;  %s36_s4 = ssub.s32 %s3423_s21, %s4675_s10 }
  0x5d   : > { %s3628_s26 = scalar_lea.hbm %s4623_s0, %s3083_s23  ;;  %p37_p9 = scmp.eq.s32.totalorder %s36_s4, 0 }
  0x5e   : > { %s106_s12 = sor.u32 %s105_s15, %s36_s4  ;;  %s4651_s1 = sadd.s32 1, %s3395_s14 }
  0x5f   : > { %p107_p11 = scmp.eq.s32.totalorder %s106_s12, 0  ;;  %s174_s9 = scalar_lea.vmem [#allocation2], %s3082_s24 }
  0x60   : > { %s3631_s29 = scalar_select %p37_p9, %s3407_s17, %s39_s6  }
  0x61   : > { %s3636_s2 = scalar_select %p107_p11, %s3395_s14, %s4651_s1  }
  0x62   : > { %s181_s20 = sshll.u32 %s174_s9, 4  ;;  %p3642_p4 = pnand %p3114_p7, %p3612_p3  ;;  %s3646_s20 = int_to_ptr.vmem [resolvable:$true] %s181_s20 }
  0x63   : > { %s3648_s15 = scalar_lea.sflag [#allocation3], %s170_s8  ;;  %s3271_s6 = scalar_lea.hbm %s3628_s26, 30720 }
  0x64   : > { %p3272_p5 = scmp.ne.s32.totalorder %s3628_s26, %s3271_s6  ;;  %p3273_p6 = pneg %p3642_p4 }
  0x65   : > { %s3276_s11 = scalar_lea.hbm %s4623_s0, 61440  ;;  %p3277_p12 = scmp.lt.u32.totalorder %s3628_s26, %s4623_s0 }
  0x66   : > { %p3274_p8 = pnand %p3273_p6, %p3272_p5  ;;  %p3278_p2 = scmp.lt.u32.totalorder %s3276_s11, %s3271_s6 }
  0x67   : > { %p3280_p1 = scmp.lt.u32.totalorder %s3271_s6, %s3628_s26 }
  0x68   : > { %p3275_p10 = pneg %p3274_p8  ;;  %p3279_p0 = por %p3278_p2, %p3277_p12 }
  0x6a   : > { %p3281_p3 = por %p3280_p1, %p3279_p0 }
  0x6c   : > { %p3282_p13 = pnand %p3281_p3, %p3275_p10 }
  0x6e   : > { %3285 = shalt.err (!%p3282_p13)
}
  0x6f   : > { %s3286_s8 = scalar_lea.vmem %s3646_s20, 30720  ;;  %s3433_s4 = smov [#allocation2]  }
  0x70   : > { %p3287_p7 = scmp.ne.s32.totalorder %s3646_s20, %s3286_s8  ;;  %s3291_s5 = sshll.u32 %s3433_s4, 4  ;;  %s3292_s5 = int_to_ptr.vmem [resolvable:$false] %s3291_s5 }
  0x71   : > { %s3293_s12 = scalar_lea.vmem %s3292_s5, 61440  ;;  %p3294_p5 = scmp.lt.s32.totalorder %s3646_s20, %s3292_s5 }
  0x72   : > { %p3289_p9 = pnand %p3287_p7, %p3273_p6  ;;  %p3295_p8 = scmp.lt.s32.totalorder %s3293_s12, %s3286_s8 }
  0x74   : > { %p3290_p11 = pneg %p3289_p9  ;;  %p3296_p12 = por %p3295_p8, %p3294_p5 }
  0x76   : > { %p3297_p2 = pnand %p3296_p12, %p3290_p11 }
  0x78   : > { %3300 = shalt.err (!%p3297_p2)
}
  0x79   : > { %s3434_s6 = smov 384   ;;  %s3435_s1 = smov 24  }
  0x7a   : > { %3107 = dma.hbm_to_vmem [thread:$0]  (!%p3642_p4), %s3628_s26, 30720, %s3646_s20, %s3648_s15, %s3434_s6, %s3434_s6, %s3435_s1  }
  0x7b   : > { %p4653_p6 = scmp.ne.s32.totalorder %s4645_s30, 0 }
  0x7c   : > { %s195_s9 = sand.u32 (!%p4653_p6), 1, %s3403_s16   ;;  %p4654_p10 = scmp.ne.s32.totalorder (!%p4653_p6), %s4641_s27, 0 }
  0x7d   : > { %193 = sbr.rel (%p4653_p6) target bundleno = 697 (0x2b9), region = 32  ;;  %s196_s23 = scalar_lea.sflag (!%p4653_p6), [#allocation3], %s195_s9 }
  0x7e   : > { %s3084_s11 = smul.u32 (!%p4653_p6), 1920, %s195_s9 }
  0x80   : > { %s3679_s24 = scalar_lea.vmem (!%p4653_p6), [#allocation2], %s3084_s11 }
  0x84   : > { %3374 = dma.done.wait (%p4654_p10), %s196_s23, 30720  }
  0x85   : > { %3376 = vsyncadd (%p4654_p10), %s196_s23, 4294936576  ;;  %p4655_p0 = scmp.ne.s32.totalorder %s4640_s25, 0 }
  0x87   : > { %3378 = dma.done.wait (%p4655_p0), [#allocation6], 13840  }
  0x88   : > { %3380 = vsyncadd (%p4655_p0), [#allocation6], 4294953456  ;;  %s3690_s20 = sshll.u32 %s3411_s18, 8  ;;  %v3436_v0 = vmov 0.0|0.0   ;;  %v472_v1 = vld [vmem:[#allocation5 + $0x120] sm:$0xff]  ;;  %v473_v2 = vld [vmem:[#allocation5 + $0x128] sm:$0xff] }
  0x89   : > { %2914 = vmatprep.subr.bf16.mxu0 %v3436_v0  ;;  %s369_s30 = sadd.s32 64, %s3690_s20  ;;  %v504_v3 = vld [vmem:[#allocation5 + $0x220] sm:$0xff]  ;;  %vm508_vm0 = vcmask 261120   ;;  %v2915_v4 = vpack.c.bf16 %v473_v2, %v472_v1  ;;  %v505_v5 = vld [vmem:[#allocation5 + $0x228] sm:$0xff]  ;;  %v474_v6 = vld [vmem:[#allocation5 + $0x130] sm:$0xff]  ;;  %s232_s25 = sshra.s32 %s3690_s20, 3 }
  0x8a   : > { %s370_s26 = sshra.s32 %s369_s30, 3  ;;  %v475_v7 = vld [vmem:[#allocation5 + $0x138] sm:$0xff]  ;;  %v2962_v8 = vpack.c.bf16 %v505_v5, %v504_v3  ;;  %v506_v9 = vld [vmem:[#allocation5 + $0x230] sm:$0xff]  ;;  %v476_v14 = vld [vmem:[#allocation5 + $0x140] sm:$0xff]  ;;  %s2635_s27 = smul.u32 24, %s232_s25 }
  0x8b   : > { %s2636_s7 = smul.u32 24, %s370_s26  ;;  %v507_v10 = vld [vmem:[#allocation5 + $0x238] sm:$0xff]  ;;  %2916 = vmatpush1.bf16.msra.mxu0 %v2915_v4  ;;  %v2918_v12 = vpack.c.bf16 %v475_v7, %v474_v6  ;;  %v477_v15 = vld [vmem:[#allocation5 + $0x148] sm:$0xff]  ;;  %v333_v16 = vld [vmem:[#allocation5] sm:$0xff]  ;;  %s1601_s4 = sadd.s32 128, %s3690_s20 }
  0x8c   : > { %v2966_v13 = vpack.c.bf16 %v507_v10, %v506_v9  ;;  %2963 = vmatprep.subr.bf16.mxu1 %v2962_v8  ;;  %2917 = vmatprep.subr.bf16.mxu0 %v3436_v0  ;;  %v334_v17 = vld [vmem:[#allocation5 + $0x8] sm:$0xff]  ;;  %v2921_v18 = vpack.c.bf16 %v477_v15, %v476_v14  ;;  %v478_v19 = vld [vmem:[#allocation5 + $0x150] sm:$0xff]  ;;  %v479_v20 = vld [vmem:[#allocation5 + $0x158] sm:$0xff]  ;;  %s3793_s8 = scalar_lea.vmem %s3679_s24, %s2635_s27 [#allocation2]  ;;  %s1602_s5 = sshra.s32 %s1601_s4, 3 }
  0x8d   : > { %s3695_s15 = scalar_lea.vmem %s3679_s24, %s2636_s7 [#allocation2]  ;;  %2965 = vmatpush3.bf16.msra.mxu1 %v2962_v8  ;;  %v2971_v22 = vpack.c.bf16 %v334_v17, %v333_v16  ;;  %v335_v24 = vld [vmem:[#allocation5 + $0x10] sm:$0xff]  ;;  %v336_v25 = vld [vmem:[#allocation5 + $0x18] sm:$0xff]  ;;  %v2924_v26 = vpack.c.bf16 %v479_v20, %v478_v19  ;;  %v480_v27 = vld [vmem:[#allocation5 + $0x160] sm:$0xff]  ;;  %s2637_s12 = smul.u32 24, %s1602_s5 }
  0x8e   : > { %v377_v11 = vld [vmem:[%s3695_s15 + $0x10] sm:$0xff]  ;;  %2967 = vmatprep.subr.bf16.mxu1 %v2966_v13  ;;  %v380_v21 = vld [vmem:[%s3695_s15 + $0x28] sm:$0xff]  ;;  %v383_v23 = vld [vmem:[%s3695_s15 + $0x40] sm:$0xff]  ;;  %v2974_v30 = vpack.c.bf16 %v336_v25, %v335_v24  ;;  %s227_s1 = sand.u32 1, %s3391_s13   ;;  %s2630_s23 = sshll.u32 %s3411_s18, 5 }
  0x8f   : > { %2754 = vmatprep.mubr.msk.f32.mxu1 %vm508_vm0, %v377_v11  ;;  %2919 = vmatpush1.bf16.msra.mxu0 %v2918_v12  ;;  %v481_v28 = vld [vmem:[#allocation5 + $0x168] sm:$0xff]  ;;  %v386_v29 = vld [vmem:[%s3695_s15 + $0x58] sm:$0xff]  ;;  %v389_v31 = vld [vmem:[%s3695_s15 + $0x70] sm:$0xff]  ;;  %s3951_s6 = scalar_lea.vmem %s3679_s24, %s2637_s12 [#allocation2]  ;;  %s2527_s9 = sshll.u32 %s227_s1, 8 }
  0x90   : > { %2920 = vmatprep.subr.bf16.mxu0 %v3436_v0  ;;  %v337_v32 = vld [vmem:[#allocation5 + $0x20] sm:$0xff]  ;;  %v338_v33 = vld [vmem:[#allocation5 + $0x28] sm:$0xff]  ;;  %v2927_v34 = vpack.c.bf16 %v481_v28, %v480_v27  ;;  %v482_v35 = vld [vmem:[#allocation5 + $0x170] sm:$0xff]  ;;  %s4441_s11 = scalar_lea.vmem [#allocation8], %s2527_s9  ;;  %s2631_s24 = sshll.u32 %s3415_s19, 6 }
  0x91   : > { %2969 = vmatpush3.bf16.msra.mxu1 %v2966_v13  ;;  %v483_v36 = vld [vmem:[#allocation5 + $0x178] sm:$0xff]  ;;  %v392_v37 = vld [vmem:[%s3695_s15 + $0x88] sm:$0xff]  ;;  %v2977_v38 = vpack.c.bf16 %v338_v33, %v337_v32  ;;  %v395_v39 = vld [vmem:[%s3695_s15 + $0xa0] sm:$0xff]  ;;  %s2402_s20 = sadd.s32 %s2631_s24, %s2630_s23  ;;  %s2405_s18 = sshll.u32 %s4441_s11, 4  ;;  %s4556_s18 = int_to_ptr.vmem [resolvable:$true] %s2405_s18 }
  0x92   : > { %2970 = vmatprep.subr.bf16.mxu1 %v3436_v0  ;;  %v339_v40 = vld [vmem:[#allocation5 + $0x30] sm:$0xff]  ;;  %v340_v41 = vld [vmem:[#allocation5 + $0x38] sm:$0xff]  ;;  %v2930_v42 = vpack.c.bf16 %v483_v36, %v482_v35  ;;  %v484_v43 = vld [vmem:[#allocation5 + $0x180] sm:$0xff]  ;;  %s2632_s30 = sshll.u32 %s2402_s20, 7  ;;  %s3301_s25 = scalar_lea.vmem %s4556_s18, 4096 }
  0x93   : > { %2922 = vmatpush1.bf16.msra.mxu0 %v2921_v18  ;;  %v485_v44 = vld [vmem:[#allocation5 + $0x188] sm:$0xff]  ;;  %v398_v45 = vld [vmem:[%s3695_s15 + $0xb8] sm:$0xff]  ;;  %v2980_v46 = vpack.c.bf16 %v340_v41, %v339_v40  ;;  %v401_v47 = vld [vmem:[%s3695_s15 + $0xd0] sm:$0xff]  ;;  %s4554_s7 = scalar_lea.hbm %s4626_s3, %s2632_s30  ;;  %p3302_p4 = scmp.ne.s32.totalorder %s4556_s18, %s3301_s25 }
  0x94   : > { %2755 = vmatmul.mubr.msk.f32.vlgmr.msra.gmra.mrb[0].mxu1 %vm508_vm0, %v380_v21  ;;  %2923 = vmatprep.subr.bf16.mxu0 %v3436_v0  ;;  %v341_v48 = vld [vmem:[#allocation5 + $0x40] sm:$0xff]  ;;  %v342_v49 = vld [vmem:[#allocation5 + $0x48] sm:$0xff]  ;;  %v2933_v50 = vpack.c.bf16 %v485_v44, %v484_v43  ;;  %v486_v51 = vld [vmem:[#allocation5 + $0x190] sm:$0xff]  ;;  %p4656_p1 = scmp.ne.s32.totalorder %s4642_s28, 0  ;;  %s3437_s27 = smov [#allocation8]  }
  0x95   : > { %2972 = vmatpush1.bf16.msra.mxu1 %v2971_v22  ;;  %2757 = vmatprep.mubr.msk.f32.mxu1 %vm508_vm0, %v383_v23  ;;  %v487_v52 = vld [vmem:[#allocation5 + $0x198] sm:$0xff]  ;;  %v404_v53 = vld [vmem:[%s3695_s15 + $0xe8] sm:$0xff]  ;;  %v2983_v54 = vpack.c.bf16 %v342_v49, %v341_v48  ;;  %v407_v55 = vld [vmem:[%s3695_s15 + $0x100] sm:$0xff] }
  0x96   : > { %2973 = vmatprep.subr.bf16.mxu1 %v3436_v0  ;;  %v343_v56 = vld [vmem:[#allocation5 + $0x50] sm:$0xff]  ;;  %v344_v57 = vld [vmem:[#allocation5 + $0x58] sm:$0xff]  ;;  %v2936_v58 = vpack.c.bf16 %v487_v52, %v486_v51  ;;  %v488_v59 = vld [vmem:[#allocation5 + $0x1a0] sm:$0xff]  ;;  %p3303_p3 = pnand %p3302_p4, %p4656_p1 }
  0x97   : > { %2925 = vmatpush1.bf16.msra.mxu0 %v2924_v26  ;;  %v489_v60 = vld [vmem:[#allocation5 + $0x1a8] sm:$0xff]  ;;  %v410_v61 = vld [vmem:[%s3695_s15 + $0x118] sm:$0xff]  ;;  %v2986_v62 = vpack.c.bf16 %v344_v57, %v343_v56  ;;  %v413_v63 = vld [vmem:[%s3695_s15 + $0x130] sm:$0xff] }
  0x98   : > { %2758 = vmatmul.mubr.msk.f32.gmra.mrb[2].mxu1 %vm508_vm0, %v386_v29  ;;  %2926 = vmatprep.subr.bf16.mxu0 %v3436_v0  ;;  %v345_v1 = vld [vmem:[#allocation5 + $0x60] sm:$0xff]  ;;  %v346_v2 = vld [vmem:[#allocation5 + $0x68] sm:$0xff]  ;;  %v2939_v4 = vpack.c.bf16 %v489_v60, %v488_v59  ;;  %v490_v5 = vld [vmem:[#allocation5 + $0x1b0] sm:$0xff]  ;;  %p3304_p13 = pneg %p3303_p3 }
  0x99   : > { %2975 = vmatpush1.bf16.msra.mxu1 %v2974_v30  ;;  %2760 = vmatprep.mubr.msk.f32.mxu1 %vm508_vm0, %v389_v31  ;;  %v376_v3 = vld [vmem:[%s3695_s15 + $0x8] sm:$0xff]  ;;  %v491_v6 = vld [vmem:[#allocation5 + $0x1b8] sm:$0xff]  ;;  %v2989_v8 = vpack.c.bf16 %v346_v2, %v345_v1  ;;  %v419_v9 = vld [vmem:[%s3695_s15 + $0x160] sm:$0xff] }
  0x9a   : > { %2976 = vmatprep.subr.bf16.mxu1 %v3436_v0  ;;  %669 = vmatprep.mubr.f32.mxu0 %v376_v3  ;;  %v416_v7 = vld [vmem:[%s3695_s15 + $0x148] sm:$0xff]  ;;  %v347_v10 = vld [vmem:[#allocation5 + $0x70] sm:$0xff]  ;;  %v348_v11 = vld [vmem:[#allocation5 + $0x78] sm:$0xff]  ;;  %v2942_v12 = vpack.c.bf16 %v491_v6, %v490_v5 }
  0x9b   : > { %2928 = vmatpush1.bf16.msra.mxu0 %v2927_v34  ;;  %v492_v13 = vld [vmem:[#allocation5 + $0x1c0] sm:$0xff]  ;;  %v493_v14 = vld [vmem:[#allocation5 + $0x1c8] sm:$0xff]  ;;  %v422_v15 = vld [vmem:[%s3695_s15 + $0x178] sm:$0xff]  ;;  %v2992_v16 = vpack.c.bf16 %v348_v11, %v347_v10 }
  0x9c   : > { %2761 = vmatmul.mubr.msk.f32.gmra.mrb[4].mxu1 %vm508_vm0, %v392_v37  ;;  %2929 = vmatprep.subr.bf16.mxu0 %v3436_v0  ;;  %v425_v17 = vld [vmem:[%s3695_s15 + $0x190] sm:$0xff]  ;;  %v349_v18 = vld [vmem:[#allocation5 + $0x80] sm:$0xff]  ;;  %v350_v19 = vld [vmem:[#allocation5 + $0x88] sm:$0xff]  ;;  %v2945_v20 = vpack.c.bf16 %v493_v14, %v492_v13 }
  0x9d   : > { %2978 = vmatpush1.bf16.msra.mxu1 %v2977_v38  ;;  %2763 = vmatprep.mubr.msk.f32.mxu1 %vm508_vm0, %v395_v39  ;;  %v494_v21 = vld [vmem:[#allocation5 + $0x1d0] sm:$0xff]  ;;  %v495_v22 = vld [vmem:[#allocation5 + $0x1d8] sm:$0xff]  ;;  %v428_v23 = vld [vmem:[%s3695_s15 + $0x1a8] sm:$0xff]  ;;  %v2995_v24 = vpack.c.bf16 %v350_v19, %v349_v18 }
  0x9e   : > { %2979 = vmatprep.subr.bf16.mxu1 %v3436_v0  ;;  %v431_v25 = vld [vmem:[%s3695_s15 + $0x1c0] sm:$0xff]  ;;  %v351_v26 = vld [vmem:[#allocation5 + $0x90] sm:$0xff]  ;;  %v352_v27 = vld [vmem:[#allocation5 + $0x98] sm:$0xff]  ;;  %v2948_v28 = vpack.c.bf16 %v495_v22, %v494_v21 }
  0x9f   : > { %2931 = vmatpush1.bf16.msra.mxu0 %v2930_v42  ;;  %v496_v29 = vld [vmem:[#allocation5 + $0x1e0] sm:$0xff]  ;;  %v497_v30 = vld [vmem:[#allocation5 + $0x1e8] sm:$0xff]  ;;  %v434_v31 = vld [vmem:[%s3695_s15 + $0x1d8] sm:$0xff]  ;;  %v2998_v32 = vpack.c.bf16 %v352_v27, %v351_v26 }
  0xa0   : > { %2764 = vmatmul.mubr.msk.f32.gmra.mrb[6].mxu1 %vm508_vm0, %v398_v45  ;;  %2932 = vmatprep.subr.bf16.mxu0 %v3436_v0  ;;  %v437_v33 = vld [vmem:[%s3695_s15 + $0x1f0] sm:$0xff]  ;;  %v353_v34 = vld [vmem:[#allocation5 + $0xa0] sm:$0xff]  ;;  %v354_v35 = vld [vmem:[#allocation5 + $0xa8] sm:$0xff]  ;;  %v2951_v36 = vpack.c.bf16 %v497_v30, %v496_v29 }
  0xa1   : > { %2981 = vmatpush1.bf16.msra.mxu1 %v2980_v46  ;;  %2766 = vmatprep.mubr.msk.f32.mxu1 %vm508_vm0, %v401_v47  ;;  %v498_v37 = vld [vmem:[#allocation5 + $0x1f0] sm:$0xff]  ;;  %v499_v38 = vld [vmem:[#allocation5 + $0x1f8] sm:$0xff]  ;;  %v440_v39 = vld [vmem:[%s3695_s15 + $0x208] sm:$0xff]  ;;  %v3001_v40 = vpack.c.bf16 %v354_v35, %v353_v34 }
  0xa2   : > { %2982 = vmatprep.subr.bf16.mxu1 %v3436_v0  ;;  %v443_v41 = vld [vmem:[%s3695_s15 + $0x220] sm:$0xff]  ;;  %v355_v42 = vld [vmem:[#allocation5 + $0xb0] sm:$0xff]  ;;  %v356_v43 = vld [vmem:[#allocation5 + $0xb8] sm:$0xff]  ;;  %v2954_v44 = vpack.c.bf16 %v499_v38, %v498_v37 }
  0xa3   : > { %2934 = vmatpush1.bf16.msra.mxu0 %v2933_v50  ;;  %v500_v45 = vld [vmem:[#allocation5 + $0x200] sm:$0xff]  ;;  %v501_v46 = vld [vmem:[#allocation5 + $0x208] sm:$0xff]  ;;  %v446_v47 = vld [vmem:[%s3695_s15 + $0x238] sm:$0xff]  ;;  %v3004_v48 = vpack.c.bf16 %v356_v43, %v355_v42 }
  0xa4   : > { %2767 = vmatmul.mubr.msk.f32.gmra.mrb[8].mxu1 %vm508_vm0, %v404_v53  ;;  %2935 = vmatprep.subr.bf16.mxu0 %v3436_v0  ;;  %v449_v49 = vld [vmem:[%s3695_s15 + $0x250] sm:$0xff]  ;;  %v357_v50 = vld [vmem:[#allocation5 + $0xc0] sm:$0xff]  ;;  %v358_v51 = vld [vmem:[#allocation5 + $0xc8] sm:$0xff]  ;;  %v2957_v52 = vpack.c.bf16 %v501_v46, %v500_v45 }
  0xa5   : > { %2984 = vmatpush1.bf16.msra.mxu1 %v2983_v54  ;;  %2769 = vmatprep.mubr.msk.f32.mxu1 %vm508_vm0, %v407_v55  ;;  %v502_v53 = vld [vmem:[#allocation5 + $0x210] sm:$0xff]  ;;  %v503_v54 = vld [vmem:[#allocation5 + $0x218] sm:$0xff]  ;;  %v452_v55 = vld [vmem:[%s3695_s15 + $0x268] sm:$0xff]  ;;  %v3007_v56 = vpack.c.bf16 %v358_v51, %v357_v50 }
  0xa6   : > { %2985 = vmatprep.subr.bf16.mxu1 %v3436_v0  ;;  %v365_v57 = vld [vmem:[#allocation5 + $0x100] sm:$0xff]  ;;  %v359_v60 = vld [vmem:[#allocation5 + $0xd0] sm:$0xff]  ;;  %v458_v1 = vld [vmem:[%s3695_s15 + $0x298] sm:$0xff] }
  0xa7   : > { %2937 = vmatpush1.bf16.msra.mxu0 %v2936_v58  ;;  %v366_v58 = vld [vmem:[#allocation5 + $0x108] sm:$0xff]  ;;  %v455_v59 = vld [vmem:[%s3695_s15 + $0x280] sm:$0xff]  ;;  %v461_v3 = vld [vmem:[%s3695_s15 + $0x2b0] sm:$0xff] }
  0xa8   : > { %2770 = vmatmul.mubr.msk.f32.gmra.mrb[10].mxu1 %vm508_vm0, %v410_v61  ;;  %2938 = vmatprep.subr.bf16.mxu0 %v3436_v0  ;;  %v360_v61 = vld [vmem:[#allocation5 + $0xd8] sm:$0xff]  ;;  %v362_v5 = vld [vmem:[#allocation5 + $0xe8] sm:$0xff]  ;;  %v375_v6 = vld [vmem:[%s3695_s15] sm:$0xff] }
  0xa9   : > { %2987 = vmatpush1.bf16.msra.mxu1 %v2986_v62  ;;  %2772 = vmatprep.mubr.msk.f32.mxu1 %vm508_vm0, %v413_v63  ;;  %v2960_v62 = vpack.c.bf16 %v503_v54, %v502_v53  ;;  %v3018_v63 = vpack.c.bf16 %v366_v58, %v365_v57  ;;  %v3010_v2 = vpack.c.bf16 %v360_v61, %v359_v60  ;;  %v464_v11 = vld [vmem:[%s3695_s15 + $0x2c8] sm:$0xff]  ;;  %v467_v13 = vld [vmem:[%s3695_s15 + $0x2e0] sm:$0xff]  ;;  %v363_v14 = vld [vmem:[#allocation5 + $0xf0] sm:$0xff] }
  0xaa   : > { %2988 = vmatprep.subr.bf16.mxu1 %v3436_v0  ;;  %v470_v18 = vld [vmem:[%s3695_s15 + $0x2f8] sm:$0xff]  ;;  %v1704_v21 = vld [vmem:[#allocation5 + $0x240] sm:$0xff]  ;;  %v1705_v22 = vld [vmem:[#allocation5 + $0x248] sm:$0xff] }
  0xab   : > { %2940 = vmatpush1.bf16.msra.mxu0 %v2939_v4  ;;  %v361_v4 = vld [vmem:[#allocation5 + $0xe0] sm:$0xff]  ;;  %v3027_v26 = vpack.c.bf16 %v1705_v22, %v1704_v21  ;;  %v1707_v29 = vld [vmem:[#allocation5 + $0x258] sm:$0xff]  ;;  %v384_v30 = vld [vmem:[%s3695_s15 + $0x48] sm:$0xff] }
  0xac   : > { %2773 = vmatmul.mubr.msk.f32.gmra.mrb[12].mxu1 %vm508_vm0, %v416_v7  ;;  %2941 = vmatprep.subr.bf16.mxu0 %v3436_v0  ;;  %v367_v7 = vld [vmem:[#allocation5 + $0x110] sm:$0xff]  ;;  %v241_v27 = vld [vmem:[%s3793_s8 + $0x20] sm:$0xff]  ;;  %v244_v34 = vld [vmem:[%s3793_s8 + $0x38] sm:$0xff] }
  0xad   : > { %2990 = vmatpush1.bf16.msra.mxu1 %v2989_v8  ;;  %2775 = vmatprep.mubr.msk.f32.mxu1 %vm508_vm0, %v419_v9  ;;  %v368_v8 = vld [vmem:[#allocation5 + $0x118] sm:$0xff]  ;;  %v379_v9 = vld [vmem:[%s3695_s15 + $0x20] sm:$0xff]  ;;  %v1710_v42 = vld [vmem:[#allocation5 + $0x270] sm:$0xff] }
  0xae   : > { %2991 = vmatprep.subr.bf16.mxu1 %v3436_v0  ;;  %v3022_v10 = vpack.c.bf16 %v368_v8, %v367_v7  ;;  %v1708_v35 = vld [vmem:[#allocation5 + $0x260] sm:$0xff]  ;;  %v1711_v43 = vld [vmem:[#allocation5 + $0x278] sm:$0xff]  ;;  %v246_v46 = vld [vmem:[%s3793_s8 + $0x48] sm:$0xff] }
  0xaf   : > { %2943 = vmatpush1.bf16.msra.mxu0 %v2942_v12  ;;  %v3013_v12 = vpack.c.bf16 %v362_v5, %v361_v4  ;;  %v387_v37 = vld [vmem:[%s3695_s15 + $0x60] sm:$0xff]  ;;  %v394_v45 = vld [vmem:[%s3695_s15 + $0x98] sm:$0xff]  ;;  %v1713_v50 = vld [vmem:[#allocation5 + $0x288] sm:$0xff] }
  0xb0   : > { %2776 = vmatmul.mubr.msk.f32.gmra.mrb[14].mxu1 %vm508_vm0, %v422_v15  ;;  %2944 = vmatprep.subr.bf16.mxu0 %v3436_v0  ;;  %v364_v15 = vld [vmem:[#allocation5 + $0xf8] sm:$0xff]  ;;  %v391_v38 = vld [vmem:[%s3695_s15 + $0x80] sm:$0xff]  ;;  %v393_v51 = vld [vmem:[%s3695_s15 + $0x90] sm:$0xff] }
  0xb1   : > { %2993 = vmatpush1.bf16.msra.mxu1 %v2992_v16  ;;  %2778 = vmatprep.mubr.msk.f32.mxu1 %vm508_vm0, %v425_v17  ;;  %v378_v16 = vld [vmem:[%s3695_s15 + $0x18] sm:$0xff]  ;;  %v3016_v19 = vpack.c.bf16 %v364_v15, %v363_v14  ;;  %v249_v53 = vld [vmem:[%s3793_s8 + $0x60] sm:$0xff]  ;;  %v396_v60 = vld [vmem:[%s3695_s15 + $0xa8] sm:$0xff] }
  0xb2   : > { %2994 = vmatprep.subr.bf16.mxu1 %v3436_v0  ;;  %v382_v17 = vld [vmem:[%s3695_s15 + $0x38] sm:$0xff]  ;;  %v253_v54 = vld [vmem:[%s3793_s8 + $0x80] sm:$0xff]  ;;  %v1717_v4 = vld [vmem:[#allocation5 + $0x2a8] sm:$0xff] }
  0xb3   : > { %2946 = vmatpush1.bf16.msra.mxu0 %v2945_v20  ;;  %v238_v20 = vld [vmem:[%s3793_s8 + $0x8] sm:$0xff]  ;;  %v1715_v57 = vld [vmem:[#allocation5 + $0x298] sm:$0xff]  ;;  %v1736_v58 = vld [vmem:[#allocation5 + $0x340] sm:$0xff] }
  0xb4   : > { %2779 = vmatmul.mubr.msk.f32.gmra.mrb[16].mxu1 %vm508_vm0, %v428_v23  ;;  %2947 = vmatprep.subr.bf16.mxu0 %v3436_v0  ;;  %v381_v23 = vld [vmem:[%s3695_s15 + $0x30] sm:$0xff]  ;;  %v399_v5 = vld [vmem:[%s3695_s15 + $0xc0] sm:$0xff]  ;;  %v258_v14 = vld [vmem:[%s3793_s8 + $0xa8] sm:$0xff] }
  0xb5   : > { %2996 = vmatpush1.bf16.msra.mxu1 %v2995_v24  ;;  %2781 = vmatprep.mubr.msk.f32.mxu1 %vm508_vm0, %v431_v25  ;;  %v385_v24 = vld [vmem:[%s3695_s15 + $0x50] sm:$0xff]  ;;  %v237_v25 = vld [vmem:[%s3793_s8] sm:$0xff] }
  0xb6   : > { %2997 = vmatprep.subr.bf16.mxu1 %v3436_v0  ;;  %v255_v7 = vld [vmem:[%s3793_s8 + $0x90] sm:$0xff]  ;;  %v261_v21 = vld [vmem:[%s3793_s8 + $0xc0] sm:$0xff] }
  0xb7   : > { %2949 = vmatpush1.bf16.msra.mxu0 %v2948_v28  ;;  %v1706_v28 = vld [vmem:[#allocation5 + $0x250] sm:$0xff] }
  0xb8   : > { %2782 = vmatmul.mubr.msk.f32.gmra.mrb[18].mxu1 %vm508_vm0, %v434_v31  ;;  %2950 = vmatprep.subr.bf16.mxu0 %v3436_v0  ;;  %v388_v31 = vld [vmem:[%s3695_s15 + $0x68] sm:$0xff] }
  0xb9   : > { %2999 = vmatpush1.bf16.msra.mxu1 %v2998_v32  ;;  %2784 = vmatprep.mubr.msk.f32.mxu1 %vm508_vm0, %v437_v33  ;;  %v240_v32 = vld [vmem:[%s3793_s8 + $0x18] sm:$0xff]  ;;  %v3030_v33 = vpack.c.bf16 %v1707_v29, %v1706_v28 }
  0xba   : > { %3000 = vmatprep.subr.bf16.mxu1 %v3436_v0  ;;  %v264_v28 = vld [vmem:[%s3793_s8 + $0xd8] sm:$0xff] }
  0xbb   : > { %2952 = vmatpush1.bf16.msra.mxu0 %v2951_v36  ;;  %v1709_v36 = vld [vmem:[#allocation5 + $0x268] sm:$0xff] }
  0xbc   : > { %2785 = vmatmul.mubr.msk.f32.gmra.mrb[20].mxu1 %vm508_vm0, %v440_v39  ;;  %2953 = vmatprep.subr.bf16.mxu0 %v3436_v0  ;;  %v243_v39 = vld [vmem:[%s3793_s8 + $0x30] sm:$0xff] }
  0xbd   : > { %3002 = vmatpush1.bf16.msra.mxu1 %v3001_v40  ;;  %2787 = vmatprep.mubr.msk.f32.mxu1 %vm508_vm0, %v443_v41  ;;  %v3033_v40 = vpack.c.bf16 %v1709_v36, %v1708_v35  ;;  %v247_v41 = vld [vmem:[%s3793_s8 + $0x50] sm:$0xff] }
  0xbe   : > { %3003 = vmatprep.subr.bf16.mxu1 %v3436_v0  ;;  %v267_v35 = vld [vmem:[%s3793_s8 + $0xf0] sm:$0xff] }
  0xbf   : > { %2955 = vmatpush1.bf16.msra.mxu0 %v2954_v44  ;;  %v390_v44 = vld [vmem:[%s3695_s15 + $0x78] sm:$0xff] }
  0xc0   : > { %2788 = vmatmul.mubr.msk.f32.gmra.mrb[22].mxu1 %vm508_vm0, %v446_v47  ;;  %2956 = vmatprep.subr.bf16.mxu0 %v3436_v0  ;;  %v3036_v47 = vpack.c.bf16 %v1711_v43, %v1710_v42  ;;  %v270_v42 = vld [vmem:[%s3793_s8 + $0x108] sm:$0xff] }
  0xc1   : > { %3005 = vmatpush1.bf16.msra.mxu1 %v3004_v48  ;;  %2790 = vmatprep.mubr.msk.f32.mxu1 %vm508_vm0, %v449_v49  ;;  %v250_v48 = vld [vmem:[%s3793_s8 + $0x68] sm:$0xff]  ;;  %v1712_v49 = vld [vmem:[#allocation5 + $0x280] sm:$0xff] }
  0xc2   : > { %3006 = vmatprep.subr.bf16.mxu1 %v3436_v0 }
  0xc3   : > { %2958 = vmatpush1.bf16.msra.mxu0 %v2957_v52  ;;  %v397_v52 = vld [vmem:[%s3695_s15 + $0xb0] sm:$0xff] }
  0xc4   : > { %2791 = vmatmul.mubr.msk.f32.gmra.mrb[24].mxu1 %vm508_vm0, %v452_v55  ;;  %2959 = vmatprep.subr.bf16.mxu0 %v3436_v0  ;;  %v3039_v55 = vpack.c.bf16 %v1713_v50, %v1712_v49  ;;  %v273_v49 = vld [vmem:[%s3793_s8 + $0x120] sm:$0xff] }
  0xc5   : > { %3008 = vmatpush1.bf16.msra.mxu1 %v3007_v56  ;;  %2793 = vmatprep.mubr.msk.f32.mxu1 %vm508_vm0, %v455_v59  ;;  %v1714_v56 = vld [vmem:[#allocation5 + $0x290] sm:$0xff]  ;;  %v1737_v59 = vld [vmem:[#allocation5 + $0x348] sm:$0xff] }
  0xc6   : > { %3009 = vmatprep.subr.bf16.mxu1 %v3436_v0  ;;  %v3828_v61 = vpack.c.bf16 %v1737_v59, %v1736_v58  ;;  %v280_v58 = vld [vmem:[%s3793_s8 + $0x158] sm:$0xff]  ;;  %v1732_v59 = vld [vmem:[#allocation5 + $0x320] sm:$0xff] }
  0xc7   : > { %2961 = vmatpush1.bf16.msra.mxu0 %v2960_v62  ;;  %v400_v62 = vld [vmem:[%s3695_s15 + $0xc8] sm:$0xff] }
  0xc8   : > { %2794 = vmatmul.mubr.msk.f32.gmra.mrb[26].mxu1 %vm508_vm0, %v458_v1  ;;  %3019 = vmatprep.subr.bf16.mxu0 %v3018_v63  ;;  %v3042_v1 = vpack.c.bf16 %v1715_v57, %v1714_v56  ;;  %v276_v56 = vld [vmem:[%s3793_s8 + $0x138] sm:$0xff] }
  0xc9   : > { %3011 = vmatpush1.bf16.msra.mxu1 %v3010_v2  ;;  %2796 = vmatprep.mubr.msk.f32.mxu1 %vm508_vm0, %v461_v3  ;;  %v256_v2 = vld [vmem:[%s3793_s8 + $0x98] sm:$0xff]  ;;  %v1716_v3 = vld [vmem:[#allocation5 + $0x2a0] sm:$0xff] }
  0xca   : > { %670 = vmatmul.mubr.f32.vlgmr.msra.gmra.mrb[0].mxu0 %v375_v6  ;;  %3012 = vmatprep.subr.bf16.mxu1 %v3436_v0  ;;  %v403_v6 = vld [vmem:[%s3695_s15 + $0xe0] sm:$0xff]  ;;  %v3045_v8 = vpack.c.bf16 %v1717_v4, %v1716_v3  ;;  %v283_v3 = vld [vmem:[%s3793_s8 + $0x170] sm:$0xff] }
  0xcb   : > { %674 = vmatprep.mubr.f32.mxu0 %v379_v9  ;;  %3021 = vmatpush3.bf16.msra.mxu0 %v3018_v63  ;;  %v252_v63 = vld [vmem:[%s3793_s8 + $0x78] sm:$0xff]  ;;  %v259_v9 = vld [vmem:[%s3793_s8 + $0xb0] sm:$0xff] }
  0xcc   : > { %2797 = vmatmul.mubr.msk.f32.gmra.mrb[28].mxu1 %vm508_vm0, %v464_v11  ;;  %3023 = vmatprep.subr.bf16.mxu0 %v3022_v10  ;;  %v1719_v11 = vld [vmem:[#allocation5 + $0x2b8] sm:$0xff]  ;;  %v1734_v4 = vld [vmem:[#allocation5 + $0x330] sm:$0xff] }
  0xcd   : > { %3014 = vmatpush1.bf16.msra.mxu1 %v3013_v12  ;;  %2799 = vmatprep.mubr.msk.f32.mxu1 %vm508_vm0, %v467_v13  ;;  %v402_v12 = vld [vmem:[%s3695_s15 + $0xd8] sm:$0xff] }
  0xce   : > { %675 = vmatmul.mubr.f32.gmra.mrb[2].mxu0 %v378_v16  ;;  %3015 = vmatprep.subr.bf16.mxu1 %v3436_v0  ;;  %v406_v13 = vld [vmem:[%s3695_s15 + $0xf8] sm:$0xff]  ;;  %v262_v16 = vld [vmem:[%s3793_s8 + $0xc8] sm:$0xff] }
  0xcf   : > { %679 = vmatprep.mubr.f32.mxu0 %v382_v17  ;;  %3025 = vmatpush3.bf16.msra.mxu0 %v3022_v10  ;;  %v1718_v10 = vld [vmem:[#allocation5 + $0x2b0] sm:$0xff]  ;;  %v1720_v17 = vld [vmem:[#allocation5 + $0x2c0] sm:$0xff] }
  0xd0   : > { %2800 = vmatmul.mubr.msk.f32.gmra.mrb[30].mxu1 %vm508_vm0, %v470_v18  ;;  %3075 = vmatprep.subr.bf16.mxu0 %v3828_v61  ;;  %v3048_v15 = vpack.c.bf16 %v1719_v11, %v1718_v10  ;;  %v1721_v18 = vld [vmem:[#allocation5 + $0x2c8] sm:$0xff]  ;;  %v429_v11 = vld [vmem:[%s3695_s15 + $0x1b0] sm:$0xff] }
  0xd1   : > { %3017 = vmatpush1.bf16.msra.mxu1 %v3016_v19  ;;  %1215 = vmatprep.mubr.f32.mxu1 %v238_v20  ;;  %v405_v19 = vld [vmem:[%s3695_s15 + $0xf0] sm:$0xff]  ;;  %v3051_v22 = vpack.c.bf16 %v1721_v18, %v1720_v17  ;;  %v286_v10 = vld [vmem:[%s3793_s8 + $0x188] sm:$0xff]  ;;  %v292_v17 = vld [vmem:[%s3793_s8 + $0x1b8] sm:$0xff] }
  0xd2   : > { %680 = vmatmul.mubr.f32.gmra.mrb[4].mxu0 %v381_v23  ;;  %3026 = vmatprep.subr.bf16.mxu1 %v3436_v0  ;;  %v409_v20 = vld [vmem:[%s3695_s15 + $0x110] sm:$0xff]  ;;  %v265_v23 = vld [vmem:[%s3793_s8 + $0xe0] sm:$0xff] }
  0xd3   : > { %684 = vmatprep.mubr.f32.mxu0 %v385_v24  ;;  %v1722_v24 = vld [vmem:[#allocation5 + $0x2d0] sm:$0xff]  ;;  %v435_v18 = vld [vmem:[%s3695_s15 + $0x1e0] sm:$0xff] }
  0xd4   : > { %1216 = vmatmul.mubr.f32.vlgmr.msra.gmra.mrb[32].mxu1 %v237_v25  ;;  %v1723_v25 = vld [vmem:[#allocation5 + $0x2d8] sm:$0xff] }
  0xd5   : > { %3028 = vmatpush1.bf16.msra.mxu1 %v3027_v26  ;;  %1220 = vmatprep.mubr.f32.mxu1 %v241_v27  ;;  %v408_v26 = vld [vmem:[%s3695_s15 + $0x108] sm:$0xff]  ;;  %v3054_v29 = vpack.c.bf16 %v1723_v25, %v1722_v24 }
  0xd6   : > { %685 = vmatmul.mubr.f32.gmra.mrb[6].mxu0 %v384_v30  ;;  %3029 = vmatprep.subr.bf16.mxu1 %v3436_v0  ;;  %v412_v27 = vld [vmem:[%s3695_s15 + $0x128] sm:$0xff]  ;;  %v268_v30 = vld [vmem:[%s3793_s8 + $0xf8] sm:$0xff] }
  0xd7   : > { %689 = vmatprep.mubr.f32.mxu0 %v388_v31  ;;  %v1724_v31 = vld [vmem:[#allocation5 + $0x2e0] sm:$0xff]  ;;  %v294_v24 = vld [vmem:[%s3793_s8 + $0x1c8] sm:$0xff] }
  0xd8   : > { %1221 = vmatmul.mubr.f32.gmra.mrb[34].mxu1 %v240_v32  ;;  %v1725_v32 = vld [vmem:[#allocation5 + $0x2e8] sm:$0xff] }
  0xd9   : > { %1225 = vmatprep.mubr.f32.mxu1 %v244_v34  ;;  %3031 = vmatpush1.bf16.msra.mxu1 %v3030_v33  ;;  %v411_v33 = vld [vmem:[%s3695_s15 + $0x120] sm:$0xff]  ;;  %v3057_v36 = vpack.c.bf16 %v1725_v32, %v1724_v31  ;;  %v298_v25 = vld [vmem:[%s3793_s8 + $0x1e8] sm:$0xff]  ;;  %v300_v32 = vld [vmem:[%s3793_s8 + $0x1f8] sm:$0xff] }
  0xda   : > { %690 = vmatmul.mubr.f32.gmra.mrb[8].mxu0 %v387_v37  ;;  %3032 = vmatprep.subr.bf16.mxu1 %v3436_v0  ;;  %v415_v34 = vld [vmem:[%s3695_s15 + $0x140] sm:$0xff]  ;;  %v271_v37 = vld [vmem:[%s3793_s8 + $0x110] sm:$0xff]  ;;  %v448_v31 = vld [vmem:[%s3695_s15 + $0x248] sm:$0xff] }
  0xdb   : > { %694 = vmatprep.mubr.f32.mxu0 %v391_v38  ;;  %v1726_v38 = vld [vmem:[#allocation5 + $0x2f0] sm:$0xff] }
  0xdc   : > { %1226 = vmatmul.mubr.f32.gmra.mrb[36].mxu1 %v243_v39  ;;  %v1727_v39 = vld [vmem:[#allocation5 + $0x2f8] sm:$0xff] }
  0xdd   : > { %1230 = vmatprep.mubr.f32.mxu1 %v247_v41  ;;  %3034 = vmatpush1.bf16.msra.mxu1 %v3033_v40  ;;  %v414_v40 = vld [vmem:[%s3695_s15 + $0x138] sm:$0xff]  ;;  %v3060_v43 = vpack.c.bf16 %v1727_v39, %v1726_v38 }
  0xde   : > { %695 = vmatmul.mubr.f32.gmra.mrb[10].mxu0 %v390_v44  ;;  %3035 = vmatprep.subr.bf16.mxu1 %v3436_v0  ;;  %v418_v41 = vld [vmem:[%s3695_s15 + $0x158] sm:$0xff]  ;;  %v274_v44 = vld [vmem:[%s3793_s8 + $0x128] sm:$0xff] }
  0xdf   : > { %699 = vmatprep.mubr.f32.mxu0 %v394_v45  ;;  %v1728_v45 = vld [vmem:[#allocation5 + $0x300] sm:$0xff]  ;;  %v450_v38 = vld [vmem:[%s3695_s15 + $0x258] sm:$0xff] }
  0xe0   : > { %1231 = vmatmul.mubr.f32.gmra.mrb[38].mxu1 %v246_v46  ;;  %v1729_v46 = vld [vmem:[#allocation5 + $0x308] sm:$0xff]  ;;  %v454_v39 = vld [vmem:[%s3695_s15 + $0x278] sm:$0xff] }
  0xe1   : > { %1235 = vmatprep.mubr.f32.mxu1 %v250_v48  ;;  %3037 = vmatpush1.bf16.msra.mxu1 %v3036_v47  ;;  %v417_v47 = vld [vmem:[%s3695_s15 + $0x150] sm:$0xff]  ;;  %v3063_v50 = vpack.c.bf16 %v1729_v46, %v1728_v45  ;;  %v313_v45 = vld [vmem:[%s3793_s8 + $0x260] sm:$0xff]  ;;  %v456_v46 = vld [vmem:[%s3695_s15 + $0x288] sm:$0xff] }
  0xe2   : > { %700 = vmatmul.mubr.f32.gmra.mrb[12].mxu0 %v393_v51  ;;  %3038 = vmatprep.subr.bf16.mxu1 %v3436_v0  ;;  %v421_v48 = vld [vmem:[%s3695_s15 + $0x170] sm:$0xff]  ;;  %v277_v51 = vld [vmem:[%s3793_s8 + $0x140] sm:$0xff] }
  0xe3   : > { %704 = vmatprep.mubr.f32.mxu0 %v397_v52  ;;  %v1730_v52 = vld [vmem:[#allocation5 + $0x310] sm:$0xff] }
  0xe4   : > { %1236 = vmatmul.mubr.f32.gmra.mrb[40].mxu1 %v249_v53  ;;  %v1731_v53 = vld [vmem:[#allocation5 + $0x318] sm:$0xff] }
  0xe5   : > { %1240 = vmatprep.mubr.f32.mxu1 %v253_v54  ;;  %3040 = vmatpush1.bf16.msra.mxu1 %v3039_v55  ;;  %v420_v54 = vld [vmem:[%s3695_s15 + $0x168] sm:$0xff]  ;;  %v3066_v57 = vpack.c.bf16 %v1731_v53, %v1730_v52  ;;  %v315_v52 = vld [vmem:[%s3793_s8 + $0x270] sm:$0xff] }
  0xe6   : > { %705 = vmatmul.mubr.f32.gmra.mrb[14].mxu0 %v396_v60  ;;  %3041 = vmatprep.subr.bf16.mxu1 %v3436_v0  ;;  %v424_v55 = vld [vmem:[%s3695_s15 + $0x188] sm:$0xff]  ;;  %v319_v53 = vld [vmem:[%s3793_s8 + $0x290] sm:$0xff] }
  0xe7   : > { %709 = vmatprep.mubr.f32.mxu0 %v400_v62  ;;  %v1733_v60 = vld [vmem:[#allocation5 + $0x328] sm:$0xff]  ;;  %v423_v62 = vld [vmem:[%s3695_s15 + $0x180] sm:$0xff] }
  0xe8   : > { %1241 = vmatmul.mubr.f32.gmra.mrb[42].mxu1 %v252_v63  ;;  %v427_v63 = vld [vmem:[%s3695_s15 + $0x1a0] sm:$0xff] }
  0xe9   : > { %1245 = vmatprep.mubr.f32.mxu1 %v256_v2  ;;  %3043 = vmatpush1.bf16.msra.mxu1 %v3042_v1  ;;  %v279_v1 = vld [vmem:[%s3793_s8 + $0x150] sm:$0xff]  ;;  %v3069_v2 = vpack.c.bf16 %v1733_v60, %v1732_v59  ;;  %v321_v60 = vld [vmem:[%s3793_s8 + $0x2a0] sm:$0xff] }
  0xea   : > { %710 = vmatmul.mubr.f32.gmra.mrb[16].mxu0 %v399_v5  ;;  %3044 = vmatprep.subr.bf16.mxu1 %v3436_v0  ;;  %v1735_v5 = vld [vmem:[#allocation5 + $0x338] sm:$0xff]  ;;  %v469_v59 = vld [vmem:[%s3695_s15 + $0x2f0] sm:$0xff] }
  0xeb   : > { %714 = vmatprep.mubr.f32.mxu0 %v403_v6  ;;  %v426_v6 = vld [vmem:[%s3695_s15 + $0x198] sm:$0xff] }
  0xec   : > { %1246 = vmatmul.mubr.f32.gmra.mrb[44].mxu1 %v255_v7  ;;  %v430_v7 = vld [vmem:[%s3695_s15 + $0x1b8] sm:$0xff] }
  0xed   : > { %1250 = vmatprep.mubr.f32.mxu1 %v259_v9  ;;  %3046 = vmatpush1.bf16.msra.mxu1 %v3045_v8  ;;  %v282_v8 = vld [vmem:[%s3793_s8 + $0x168] sm:$0xff]  ;;  %v3072_v9 = vpack.c.bf16 %v1735_v5, %v1734_v4  ;;  %v1739_v4 = vld [vmem:[#allocation5 + $0x358] sm:$0xff] }
  0xee   : > { %715 = vmatmul.mubr.f32.gmra.mrb[18].mxu0 %v402_v12  ;;  %3047 = vmatprep.subr.bf16.mxu1 %v3436_v0  ;;  %v433_v12 = vld [vmem:[%s3695_s15 + $0x1d0] sm:$0xff]  ;;  %v328_v5 = vld [vmem:[%s3793_s8 + $0x2d8] sm:$0xff] }
  0xef   : > { %719 = vmatprep.mubr.f32.mxu0 %v406_v13  ;;  %v285_v13 = vld [vmem:[%s3793_s8 + $0x180] sm:$0xff] }
  0xf0   : > { %1251 = vmatmul.mubr.f32.gmra.mrb[46].mxu1 %v258_v14  ;;  %v289_v14 = vld [vmem:[%s3793_s8 + $0x1a0] sm:$0xff] }
  0xf1   : > { %1255 = vmatprep.mubr.f32.mxu1 %v262_v16  ;;  %3049 = vmatpush1.bf16.msra.mxu1 %v3048_v15  ;;  %v432_v15 = vld [vmem:[%s3695_s15 + $0x1c8] sm:$0xff] }
  0xf2   : > { %720 = vmatmul.mubr.f32.gmra.mrb[20].mxu0 %v405_v19  ;;  %3050 = vmatprep.subr.bf16.mxu1 %v3436_v0  ;;  %v436_v16 = vld [vmem:[%s3695_s15 + $0x1e8] sm:$0xff]  ;;  %v439_v19 = vld [vmem:[%s3695_s15 + $0x200] sm:$0xff] }
  0xf3   : > { %724 = vmatprep.mubr.f32.mxu0 %v409_v20  ;;  %v291_v20 = vld [vmem:[%s3793_s8 + $0x1b0] sm:$0xff] }
  0xf4   : > { %1256 = vmatmul.mubr.f32.gmra.mrb[48].mxu1 %v261_v21  ;;  %v295_v21 = vld [vmem:[%s3793_s8 + $0x1d0] sm:$0xff] }
  0xf5   : > { %1260 = vmatprep.mubr.f32.mxu1 %v265_v23  ;;  %3052 = vmatpush1.bf16.msra.mxu1 %v3051_v22  ;;  %v438_v22 = vld [vmem:[%s3695_s15 + $0x1f8] sm:$0xff] }
  0xf6   : > { %725 = vmatmul.mubr.f32.gmra.mrb[22].mxu0 %v408_v26  ;;  %3053 = vmatprep.subr.bf16.mxu1 %v3436_v0  ;;  %v442_v23 = vld [vmem:[%s3695_s15 + $0x218] sm:$0xff]  ;;  %v441_v26 = vld [vmem:[%s3695_s15 + $0x210] sm:$0xff] }
  0xf7   : > { %729 = vmatprep.mubr.f32.mxu0 %v412_v27  ;;  %v445_v27 = vld [vmem:[%s3695_s15 + $0x230] sm:$0xff] }
  0xf8   : > { %1261 = vmatmul.mubr.f32.gmra.mrb[50].mxu1 %v264_v28  ;;  %v297_v28 = vld [vmem:[%s3793_s8 + $0x1e0] sm:$0xff] }
  0xf9   : > { %1265 = vmatprep.mubr.f32.mxu1 %v268_v30  ;;  %3055 = vmatpush1.bf16.msra.mxu1 %v3054_v29  ;;  %v301_v29 = vld [vmem:[%s3793_s8 + $0x200] sm:$0xff]  ;;  %v444_v30 = vld [vmem:[%s3695_s15 + $0x228] sm:$0xff] }
  0xfa   : > { %730 = vmatmul.mubr.f32.gmra.mrb[24].mxu0 %v411_v33  ;;  %3056 = vmatprep.subr.bf16.mxu1 %v3436_v0  ;;  %v304_v33 = vld [vmem:[%s3793_s8 + $0x218] sm:$0xff] }
  0xfb   : > { %734 = vmatprep.mubr.f32.mxu0 %v415_v34  ;;  %v447_v34 = vld [vmem:[%s3695_s15 + $0x240] sm:$0xff] }
  0xfc   : > { %1266 = vmatmul.mubr.f32.gmra.mrb[52].mxu1 %v267_v35  ;;  %v451_v35 = vld [vmem:[%s3695_s15 + $0x260] sm:$0xff] }
  0xfd   : > { %1270 = vmatprep.mubr.f32.mxu1 %v271_v37  ;;  %3058 = vmatpush1.bf16.msra.mxu1 %v3057_v36  ;;  %v303_v36 = vld [vmem:[%s3793_s8 + $0x210] sm:$0xff] }
  0xfe   : > { %735 = vmatmul.mubr.f32.gmra.mrb[26].mxu0 %v414_v40  ;;  %3059 = vmatprep.subr.bf16.mxu1 %v3436_v0  ;;  %v307_v37 = vld [vmem:[%s3793_s8 + $0x230] sm:$0xff]  ;;  %v306_v40 = vld [vmem:[%s3793_s8 + $0x228] sm:$0xff] }
  0xff   : > { %739 = vmatprep.mubr.f32.mxu0 %v418_v41  ;;  %v310_v41 = vld [vmem:[%s3793_s8 + $0x248] sm:$0xff] }
 0x100   : > { %1271 = vmatmul.mubr.f32.gmra.mrb[54].mxu1 %v270_v42  ;;  %v453_v42 = vld [vmem:[%s3695_s15 + $0x270] sm:$0xff] }
 0x101   : > { %1275 = vmatprep.mubr.f32.mxu1 %v274_v44  ;;  %3061 = vmatpush1.bf16.msra.mxu1 %v3060_v43  ;;  %v457_v43 = vld [vmem:[%s3695_s15 + $0x290] sm:$0xff]  ;;  %v309_v44 = vld [vmem:[%s3793_s8 + $0x240] sm:$0xff] }
 0x102   : > { %740 = vmatmul.mubr.f32.gmra.mrb[28].mxu0 %v417_v47  ;;  %3062 = vmatprep.subr.bf16.mxu1 %v3436_v0  ;;  %v460_v47 = vld [vmem:[%s3695_s15 + $0x2a8] sm:$0xff] }
 0x103   : > { %744 = vmatprep.mubr.f32.mxu0 %v421_v48  ;;  %v312_v48 = vld [vmem:[%s3793_s8 + $0x258] sm:$0xff] }
 0x104   : > { %1276 = vmatmul.mubr.f32.gmra.mrb[56].mxu1 %v273_v49  ;;  %v316_v49 = vld [vmem:[%s3793_s8 + $0x278] sm:$0xff] }
 0x105   : > { %1280 = vmatprep.mubr.f32.mxu1 %v277_v51  ;;  %3064 = vmatpush1.bf16.msra.mxu1 %v3063_v50  ;;  %v459_v50 = vld [vmem:[%s3695_s15 + $0x2a0] sm:$0xff] }
 0x106   : > { %745 = vmatmul.mubr.f32.gmra.mrb[30].mxu0 %v420_v54  ;;  %3065 = vmatprep.subr.bf16.mxu1 %v3436_v0  ;;  %v463_v51 = vld [vmem:[%s3695_s15 + $0x2c0] sm:$0xff]  ;;  %v462_v54 = vld [vmem:[%s3695_s15 + $0x2b8] sm:$0xff] }
 0x107   : > { %749 = vmatprep.mubr.f32.mxu0 %v424_v55  ;;  %v466_v55 = vld [vmem:[%s3695_s15 + $0x2d8] sm:$0xff] }
 0x108   : > { %1281 = vmatmul.mubr.f32.gmra.mrb[58].mxu1 %v276_v56  ;;  %v318_v56 = vld [vmem:[%s3793_s8 + $0x288] sm:$0xff] }
 0x109   : > { %1285 = vmatprep.mubr.f32.mxu1 %v280_v58  ;;  %3067 = vmatpush1.bf16.msra.mxu1 %v3066_v57  ;;  %v322_v57 = vld [vmem:[%s3793_s8 + $0x2a8] sm:$0xff]  ;;  %v465_v58 = vld [vmem:[%s3695_s15 + $0x2d0] sm:$0xff] }
 0x10a   : > { %750 = vmatmul.mubr.f32.gmra.mrb[32].mxu0 %v423_v62  ;;  %3068 = vmatprep.subr.bf16.mxu1 %v3436_v0  ;;  %v325_v62 = vld [vmem:[%s3793_s8 + $0x2c0] sm:$0xff] }
 0x10b   : > { %754 = vmatprep.mubr.f32.mxu0 %v427_v63  ;;  %v468_v63 = vld [vmem:[%s3695_s15 + $0x2e8] sm:$0xff]  ;;  %s4562_s15 = scalar_lea.sflag [#allocation4], %s227_s1 }
 0x10c   : > { %1286 = vmatmul.mubr.f32.gmra.mrb[60].mxu1 %v279_v1  ;;  %v239_v1 = vld [vmem:[%s3793_s8 + $0x10] sm:$0xff] }
 0x10d   : > { %1290 = vmatprep.mubr.f32.mxu1 %v283_v3  ;;  %3070 = vmatpush1.bf16.msra.mxu1 %v3069_v2  ;;  %v324_v2 = vld [vmem:[%s3793_s8 + $0x2b8] sm:$0xff]  ;;  %v1738_v3 = vld [vmem:[#allocation5 + $0x350] sm:$0xff] }
 0x10e   : > { %755 = vmatmul.mubr.f32.gmra.mrb[34].mxu0 %v426_v6  ;;  %3071 = vmatprep.subr.bf16.mxu1 %v3436_v0  ;;  %v288_v0 = vld [vmem:[%s3793_s8 + $0x198] sm:$0xff]  ;;  %v242_v6 = vld [vmem:[%s3793_s8 + $0x28] sm:$0xff] }
 0x10f   : > { %759 = vmatprep.mubr.f32.mxu0 %v430_v7  ;;  %v245_v7 = vld [vmem:[%s3793_s8 + $0x40] sm:$0xff] }
 0x110   : > { %1291 = vmatmul.mubr.f32.gmra.mrb[62].mxu1 %v282_v8  ;;  %v3078_v8 = vpack.c.bf16 %v1739_v4, %v1738_v3  ;;  %v1637_v3 = vld [vmem:[%s3951_s6 + $0xf0] sm:$0xff] }
 0x111   : > { %1295 = vmatprep.mubr.f32.mxu1 %v286_v10  ;;  %3073 = vmatpush1.bf16.msra.mxu1 %v3072_v9  ;;  %v327_v9 = vld [vmem:[%s3793_s8 + $0x2d0] sm:$0xff] }
 0x112   : > { %760 = vmatmul.mubr.f32.gmra.mrb[36].mxu0 %v429_v11  ;;  %v331_v10 = vld [vmem:[%s3793_s8 + $0x2f0] sm:$0xff]  ;;  %v248_v11 = vld [vmem:[%s3793_s8 + $0x58] sm:$0xff] }
 0x113   : > { %764 = vmatprep.mubr.f32.mxu0 %v433_v12  ;;  %v251_v12 = vld [vmem:[%s3793_s8 + $0x70] sm:$0xff] }
 0x114   : > { %1296 = vmatmul.mubr.f32.gmra.mrb[64].mxu1 %v285_v13  ;;  %v330_v13 = vld [vmem:[%s3793_s8 + $0x2e8] sm:$0xff]  ;;  %v1641_v4 = vld [vmem:[%s3951_s6 + $0x110] sm:$0xff] }
 0x115   : > { %1300 = vmatprep.mubr.f32.mxu1 %v289_v14  ;;  %v1608_v14 = vld [vmem:[%s3951_s6 + $0x8] sm:$0xff] }
 0x116   : > { %765 = vmatmul.mubr.f32.gmra.mrb[38].mxu0 %v432_v15  ;;  %v254_v15 = vld [vmem:[%s3793_s8 + $0x88] sm:$0xff] }
 0x117   : > { %769 = vmatprep.mubr.f32.mxu0 %v436_v16  ;;  %v1607_v16 = vld [vmem:[%s3951_s6] sm:$0xff] }
 0x118   : > { %1301 = vmatmul.mubr.f32.gmra.mrb[66].mxu1 %v288_v0  ;;  %v1611_v0 = vld [vmem:[%s3951_s6 + $0x20] sm:$0xff] }
 0x119   : > { %1305 = vmatprep.mubr.f32.mxu1 %v292_v17  ;;  %v260_v17 = vld [vmem:[%s3793_s8 + $0xb8] sm:$0xff] }
 0x11a   : > { %770 = vmatmul.mubr.f32.gmra.mrb[40].mxu0 %v435_v18  ;;  %v263_v18 = vld [vmem:[%s3793_s8 + $0xd0] sm:$0xff] }
 0x11b   : > { %774 = vmatprep.mubr.f32.mxu0 %v439_v19  ;;  %v1610_v19 = vld [vmem:[%s3951_s6 + $0x18] sm:$0xff] }
 0x11c   : > { %1306 = vmatmul.mubr.f32.gmra.mrb[68].mxu1 %v291_v20  ;;  %v1614_v20 = vld [vmem:[%s3951_s6 + $0x38] sm:$0xff] }
 0x11d   : > { %1310 = vmatprep.mubr.f32.mxu1 %v295_v21  ;;  %v266_v21 = vld [vmem:[%s3793_s8 + $0xe8] sm:$0xff] }
 0x11e   : > { %775 = vmatmul.mubr.f32.gmra.mrb[42].mxu0 %v438_v22  ;;  %v269_v22 = vld [vmem:[%s3793_s8 + $0x100] sm:$0xff] }
 0x11f   : > { %779 = vmatprep.mubr.f32.mxu0 %v442_v23  ;;  %v1613_v23 = vld [vmem:[%s3951_s6 + $0x30] sm:$0xff] }
 0x120   : > { %1311 = vmatmul.mubr.f32.gmra.mrb[70].mxu1 %v294_v24  ;;  %v1617_v24 = vld [vmem:[%s3951_s6 + $0x50] sm:$0xff] }
 0x121   : > { %1315 = vmatprep.mubr.f32.mxu1 %v298_v25  ;;  %v272_v25 = vld [vmem:[%s3793_s8 + $0x118] sm:$0xff] }
 0x122   : > { %780 = vmatmul.mubr.f32.gmra.mrb[44].mxu0 %v441_v26  ;;  %v275_v26 = vld [vmem:[%s3793_s8 + $0x130] sm:$0xff] }
 0x123   : > { %784 = vmatprep.mubr.f32.mxu0 %v445_v27  ;;  %v1616_v27 = vld [vmem:[%s3951_s6 + $0x48] sm:$0xff] }
 0x124   : > { %1316 = vmatmul.mubr.f32.gmra.mrb[72].mxu1 %v297_v28  ;;  %v1620_v28 = vld [vmem:[%s3951_s6 + $0x68] sm:$0xff] }
 0x125   : > { %1320 = vmatprep.mubr.f32.mxu1 %v301_v29  ;;  %v278_v29 = vld [vmem:[%s3793_s8 + $0x148] sm:$0xff] }
 0x126   : > { %785 = vmatmul.mubr.f32.gmra.mrb[46].mxu0 %v444_v30  ;;  %v281_v30 = vld [vmem:[%s3793_s8 + $0x160] sm:$0xff] }
 0x127   : > { %789 = vmatprep.mubr.f32.mxu0 %v448_v31  ;;  %v1619_v31 = vld [vmem:[%s3951_s6 + $0x60] sm:$0xff] }
 0x128   : > { %1321 = vmatmul.mubr.f32.gmra.mrb[74].mxu1 %v300_v32  ;;  %v1623_v32 = vld [vmem:[%s3951_s6 + $0x80] sm:$0xff] }
 0x129   : > { %1325 = vmatprep.mubr.f32.mxu1 %v304_v33  ;;  %v284_v33 = vld [vmem:[%s3793_s8 + $0x178] sm:$0xff] }
 0x12a   : > { %790 = vmatmul.mubr.f32.gmra.mrb[48].mxu0 %v447_v34  ;;  %v287_v34 = vld [vmem:[%s3793_s8 + $0x190] sm:$0xff] }
 0x12b   : > { %794 = vmatprep.mubr.f32.mxu0 %v451_v35  ;;  %v1622_v35 = vld [vmem:[%s3951_s6 + $0x78] sm:$0xff] }
 0x12c   : > { %1326 = vmatmul.mubr.f32.gmra.mrb[76].mxu1 %v303_v36  ;;  %v1626_v36 = vld [vmem:[%s3951_s6 + $0x98] sm:$0xff] }
 0x12d   : > { %1330 = vmatprep.mubr.f32.mxu1 %v307_v37 }
 0x12e   : > { %795 = vmatmul.mubr.f32.gmra.mrb[50].mxu0 %v450_v38  ;;  %v290_v38 = vld [vmem:[%s3793_s8 + $0x1a8] sm:$0xff] }
 0x12f   : > { %799 = vmatprep.mubr.f32.mxu0 %v454_v39 }
 0x130   : > { %1331 = vmatmul.mubr.f32.gmra.mrb[78].mxu1 %v306_v40  ;;  %v293_v40 = vld [vmem:[%s3793_s8 + $0x1c0] sm:$0xff] }
 0x131   : > { %1335 = vmatprep.mubr.f32.mxu1 %v310_v41  ;;  %v1625_v41 = vld [vmem:[%s3951_s6 + $0x90] sm:$0xff] }
 0x132   : > { %800 = vmatmul.mubr.f32.gmra.mrb[52].mxu0 %v453_v42  ;;  %v1629_v42 = vld [vmem:[%s3951_s6 + $0xb0] sm:$0xff] }
 0x133   : > { %804 = vmatprep.mubr.f32.mxu0 %v457_v43 }
 0x134   : > { %1336 = vmatmul.mubr.f32.gmra.mrb[80].mxu1 %v309_v44  ;;  %v296_v44 = vld [vmem:[%s3793_s8 + $0x1d8] sm:$0xff] }
 0x135   : > { %1340 = vmatprep.mubr.f32.mxu1 %v313_v45 }
 0x136   : > { %805 = vmatmul.mubr.f32.gmra.mrb[54].mxu0 %v456_v46  ;;  %v299_v46 = vld [vmem:[%s3793_s8 + $0x1f0] sm:$0xff] }
 0x137   : > { %809 = vmatprep.mubr.f32.mxu0 %v460_v47  ;;  %v1628_v47 = vld [vmem:[%s3951_s6 + $0xa8] sm:$0xff] }
 0x138   : > { %1341 = vmatmul.mubr.f32.gmra.mrb[82].mxu1 %v312_v48  ;;  %v1632_v48 = vld [vmem:[%s3951_s6 + $0xc8] sm:$0xff] }
 0x139   : > { %1345 = vmatprep.mubr.f32.mxu1 %v316_v49 }
 0x13a   : > { %810 = vmatmul.mubr.f32.gmra.mrb[56].mxu0 %v459_v50  ;;  %v302_v50 = vld [vmem:[%s3793_s8 + $0x208] sm:$0xff] }
 0x13b   : > { %814 = vmatprep.mubr.f32.mxu0 %v463_v51 }
 0x13c   : > { %1346 = vmatmul.mubr.f32.gmra.mrb[84].mxu1 %v315_v52  ;;  %v305_v52 = vld [vmem:[%s3793_s8 + $0x220] sm:$0xff] }
 0x13d   : > { %1350 = vmatprep.mubr.f32.mxu1 %v319_v53  ;;  %v1631_v53 = vld [vmem:[%s3951_s6 + $0xc0] sm:$0xff] }
 0x13e   : > { %815 = vmatmul.mubr.f32.gmra.mrb[58].mxu0 %v462_v54  ;;  %v1635_v54 = vld [vmem:[%s3951_s6 + $0xe0] sm:$0xff] }
 0x13f   : > { %819 = vmatprep.mubr.f32.mxu0 %v466_v55 }
 0x140   : > { %1351 = vmatmul.mubr.f32.gmra.mrb[86].mxu1 %v318_v56  ;;  %v308_v56 = vld [vmem:[%s3793_s8 + $0x238] sm:$0xff] }
 0x141   : > { %1355 = vmatprep.mubr.f32.mxu1 %v322_v57 }
 0x142   : > { %820 = vmatmul.mubr.f32.gmra.mrb[60].mxu0 %v465_v58  ;;  %v311_v58 = vld [vmem:[%s3793_s8 + $0x250] sm:$0xff] }
 0x143   : > { %824 = vmatprep.mubr.f32.mxu0 %v469_v59  ;;  %v1634_v59 = vld [vmem:[%s3951_s6 + $0xd8] sm:$0xff] }
 0x144   : > { %1356 = vmatmul.mubr.f32.gmra.mrb[88].mxu1 %v321_v60  ;;  %v1638_v60 = vld [vmem:[%s3951_s6 + $0xf8] sm:$0xff] }
 0x145   : > { %1360 = vmatprep.mubr.f32.mxu1 %v325_v62 }
 0x146   : > { %825 = vmatmul.mubr.f32.gmra.mrb[62].mxu0 %v468_v63  ;;  %v314_v63 = vld [vmem:[%s3793_s8 + $0x268] sm:$0xff] }
 0x147   : > { %2810 = vmatprep.mubr.msk.f32.mxu0 %vm508_vm0, %v239_v1 }
 0x148   : > { %1361 = vmatmul.mubr.f32.gmra.mrb[90].mxu1 %v324_v2  ;;  %v317_v2 = vld [vmem:[%s3793_s8 + $0x280] sm:$0xff] }
 0x149   : > { %1365 = vmatprep.mubr.f32.mxu1 %v328_v5 }
 0x14a   : > { %2811 = vmatmul.mubr.msk.f32.vlgmr.msra.gmra.mrb[64].mxu0 %vm508_vm0, %v242_v6  ;;  %v320_v6 = vld [vmem:[%s3793_s8 + $0x298] sm:$0xff] }
 0x14b   : > { %2813 = vmatprep.mubr.msk.f32.mxu0 %vm508_vm0, %v245_v7  ;;  %3077 = vmatpush3.bf16.msra.mxu0 %v3828_v61  ;;  %v257_v61 = vld [vmem:[%s3793_s8 + $0xa0] sm:$0xff] }
 0x14c   : > { %1366 = vmatmul.mubr.f32.gmra.mrb[92].mxu1 %v327_v9  ;;  %3079 = vmatprep.subr.bf16.mxu0 %v3078_v8  ;;  %v1640_v9 = vld [vmem:[%s3951_s6 + $0x108] sm:$0xff] }
 0x14d   : > { %1370 = vmatprep.mubr.f32.mxu1 %v331_v10  ;;  %v1644_v10 = vld [vmem:[%s3951_s6 + $0x128] sm:$0xff] }
 0x14e   : > { %2814 = vmatmul.mubr.msk.f32.gmra.mrb[66].mxu0 %vm508_vm0, %v248_v11 }
 0x14f   : > { %2816 = vmatprep.mubr.msk.f32.mxu0 %vm508_vm0, %v251_v12  ;;  %3081 = vmatpush3.bf16.msra.mxu0 %v3078_v8  ;;  %v323_v8 = vld [vmem:[%s3793_s8 + $0x2b0] sm:$0xff]  ;;  %v326_v12 = vld [vmem:[%s3793_s8 + $0x2c8] sm:$0xff] }
 0x150   : > { %1371 = vmatmul.mubr.f32.gmra.mrb[94].mxu1 %v330_v13 }
 0x151   : > { %1900 = vmatprep.mubr.f32.mxu1 %v1608_v14  ;;  %v329_v14 = vld [vmem:[%s3793_s8 + $0x2e0] sm:$0xff] }
 0x152   : > { %2817 = vmatmul.mubr.msk.f32.gmra.mrb[68].mxu0 %vm508_vm0, %v254_v15  ;;  %v1643_v15 = vld [vmem:[%s3951_s6 + $0x120] sm:$0xff] }
 0x153   : > { %2819 = vmatprep.mubr.msk.f32.mxu0 %vm508_vm0, %v257_v61  ;;  %v1647_v61 = vld [vmem:[%s3951_s6 + $0x140] sm:$0xff] }
 0x154   : > { %1901 = vmatmul.mubr.f32.vlgmr.msra.gmra.mrb[96].mxu1 %v1607_v16 }
 0x155   : > { %1905 = vmatprep.mubr.f32.mxu1 %v1611_v0  ;;  %v332_v0 = vld [vmem:[%s3793_s8 + $0x2f8] sm:$0xff]  ;;  %s3305_s8 = sshll.u32 %s3437_s27, 4  ;;  %s3306_s8 = int_to_ptr.vmem [resolvable:$false] %s3305_s8 }
 0x156   : > { %2820 = vmatmul.mubr.msk.f32.gmra.mrb[70].mxu0 %vm508_vm0, %v260_v17  ;;  %s3307_s4 = scalar_lea.vmem %s3306_s8, 8192  ;;  %p3308_p7 = scmp.lt.s32.totalorder %s4556_s18, %s3306_s8 }
 0x157   : > { %2822 = vmatprep.mubr.msk.f32.mxu0 %vm508_vm0, %v263_v18  ;;  %v1609_v18 = vld [vmem:[%s3951_s6 + $0x10] sm:$0xff]  ;;  %p3309_p9 = scmp.lt.s32.totalorder %s3307_s4, %s3301_s25 }
 0x158   : > { %1906 = vmatmul.mubr.f32.gmra.mrb[98].mxu1 %v1610_v19  ;;  %v1646_v19 = vld [vmem:[%s3951_s6 + $0x138] sm:$0xff] }
 0x159   : > { %1910 = vmatprep.mubr.f32.mxu1 %v1614_v20  ;;  %v1650_v20 = vld [vmem:[%s3951_s6 + $0x158] sm:$0xff]  ;;  %p3310_p11 = por %p3309_p9, %p3308_p7 }
 0x15a   : > { %2823 = vmatmul.mubr.msk.f32.gmra.mrb[72].mxu0 %vm508_vm0, %v266_v21 }
 0x15b   : > { %2825 = vmatprep.mubr.msk.f32.mxu0 %vm508_vm0, %v269_v22  ;;  %v1612_v22 = vld [vmem:[%s3951_s6 + $0x28] sm:$0xff]  ;;  %p3311_p5 = pnand %p3310_p11, %p3304_p13 }
 0x15c   : > { %1911 = vmatmul.mubr.f32.gmra.mrb[100].mxu1 %v1613_v23 }
 0x15d   : > { %1915 = vmatprep.mubr.f32.mxu1 %v1617_v24  ;;  %v1615_v24 = vld [vmem:[%s3951_s6 + $0x40] sm:$0xff] }
 0x15e   : > { %2826 = vmatmul.mubr.msk.f32.gmra.mrb[74].mxu0 %vm508_vm0, %v272_v25  ;;  %v1649_v25 = vld [vmem:[%s3951_s6 + $0x150] sm:$0xff] }
 0x15f   : > { %2828 = vmatprep.mubr.msk.f32.mxu0 %vm508_vm0, %v275_v26  ;;  %v1653_v26 = vld [vmem:[%s3951_s6 + $0x170] sm:$0xff] }
 0x160   : > { %1916 = vmatmul.mubr.f32.gmra.mrb[102].mxu1 %v1616_v27 }
 0x161   : > { %1920 = vmatprep.mubr.f32.mxu1 %v1620_v28  ;;  %v1618_v28 = vld [vmem:[%s3951_s6 + $0x58] sm:$0xff] }
 0x162   : > { %2829 = vmatmul.mubr.msk.f32.gmra.mrb[76].mxu0 %vm508_vm0, %v278_v29 }
 0x163   : > { %2831 = vmatprep.mubr.msk.f32.mxu0 %vm508_vm0, %v281_v30  ;;  %v1621_v30 = vld [vmem:[%s3951_s6 + $0x70] sm:$0xff] }
 0x164   : > { %1921 = vmatmul.mubr.f32.gmra.mrb[104].mxu1 %v1619_v31  ;;  %v1652_v31 = vld [vmem:[%s3951_s6 + $0x168] sm:$0xff] }
 0x165   : > { %1925 = vmatprep.mubr.f32.mxu1 %v1623_v32  ;;  %v1656_v32 = vld [vmem:[%s3951_s6 + $0x188] sm:$0xff] }
 0x166   : > { %2832 = vmatmul.mubr.msk.f32.gmra.mrb[78].mxu0 %vm508_vm0, %v284_v33 }
 0x167   : > { %v3994_v37 = vpop.f32.mrb[0].mxu1  ;;  %2834 = vmatprep.mubr.msk.f32.mxu0 %vm508_vm0, %v287_v34  ;;  %v1624_v34 = vld [vmem:[%s3951_s6 + $0x88] sm:$0xff] }
 0x168   : > { %v3998_v39 = vpop.f32.mrb[1].mxu1  ;;  %1926 = vmatmul.mubr.f32.gmra.mrb[106].mxu1 %v1622_v35 }
 0x169   : > { %1930 = vmatprep.mubr.f32.mxu1 %v1626_v36  ;;  %v1627_v36 = vld [vmem:[%s3951_s6 + $0xa0] sm:$0xff] }
 0x16a   : > { %2835 = vmatmul.mubr.msk.f32.gmra.mrb[80].mxu0 %vm508_vm0, %v290_v38  ;;  %v1655_v38 = vld [vmem:[%s3951_s6 + $0x180] sm:$0xff] }
 0x16b   : > { %v4004_v43 = vpop.f32.mrb[2].mxu1  ;;  %2837 = vmatprep.mubr.msk.f32.mxu0 %vm508_vm0, %v293_v40  ;;  %v1659_v40 = vld [vmem:[%s3951_s6 + $0x1a0] sm:$0xff] }
 0x16c   : > { %v4008_v45 = vpop.f32.mrb[3].mxu1  ;;  %1931 = vmatmul.mubr.f32.gmra.mrb[108].mxu1 %v1625_v41 }
 0x16d   : > { %1935 = vmatprep.mubr.f32.mxu1 %v1629_v42  ;;  %v1630_v42 = vld [vmem:[%s3951_s6 + $0xb8] sm:$0xff] }
 0x16e   : > { %2838 = vmatmul.mubr.msk.f32.gmra.mrb[82].mxu0 %vm508_vm0, %v296_v44 }
 0x16f   : > { %v4014_v49 = vpop.f32.mrb[4].mxu1  ;;  %2840 = vmatprep.mubr.msk.f32.mxu0 %vm508_vm0, %v299_v46  ;;  %v1633_v46 = vld [vmem:[%s3951_s6 + $0xd0] sm:$0xff] }
 0x170   : > { %v4018_v51 = vpop.f32.mrb[5].mxu1  ;;  %1936 = vmatmul.mubr.f32.gmra.mrb[110].mxu1 %v1628_v47  ;;  %v1658_v47 = vld [vmem:[%s3951_s6 + $0x198] sm:$0xff] }
 0x171   : > { %1940 = vmatprep.mubr.f32.mxu1 %v1632_v48  ;;  %v1662_v48 = vld [vmem:[%s3951_s6 + $0x1b8] sm:$0xff] }
 0x172   : > { %2841 = vmatmul.mubr.msk.f32.gmra.mrb[84].mxu0 %vm508_vm0, %v302_v50 }
 0x173   : > { %v4024_v55 = vpop.f32.mrb[6].mxu1  ;;  %2843 = vmatprep.mubr.msk.f32.mxu0 %vm508_vm0, %v305_v52  ;;  %v1636_v52 = vld [vmem:[%s3951_s6 + $0xe8] sm:$0xff] }
 0x174   : > { %v4028_v57 = vpop.f32.mrb[7].mxu1  ;;  %1941 = vmatmul.mubr.f32.gmra.mrb[112].mxu1 %v1631_v53 }
 0x175   : > { %1945 = vmatprep.mubr.f32.mxu1 %v1635_v54  ;;  %v1639_v54 = vld [vmem:[%s3951_s6 + $0x100] sm:$0xff] }
 0x176   : > { %2844 = vmatmul.mubr.msk.f32.gmra.mrb[86].mxu0 %vm508_vm0, %v308_v56  ;;  %v1661_v56 = vld [vmem:[%s3951_s6 + $0x1b0] sm:$0xff] }
 0x177   : > { %v4034_v62 = vpop.f32.mrb[8].mxu1  ;;  %2846 = vmatprep.mubr.msk.f32.mxu0 %vm508_vm0, %v311_v58  ;;  %v1665_v58 = vld [vmem:[%s3951_s6 + $0x1d0] sm:$0xff] }
 0x178   : > { %v4038_v1 = vpop.f32.mrb[9].mxu1  ;;  %1946 = vmatmul.mubr.f32.gmra.mrb[114].mxu1 %v1634_v59 }
 0x179   : > { %1950 = vmatprep.mubr.f32.mxu1 %v1638_v60  ;;  %v1642_v60 = vld [vmem:[%s3951_s6 + $0x118] sm:$0xff] }
 0x17a   : > { %2847 = vmatmul.mubr.msk.f32.gmra.mrb[88].mxu0 %vm508_vm0, %v314_v63 }
 0x17b   : > { %v4044_v5 = vpop.f32.mrb[10].mxu1  ;;  %2849 = vmatprep.mubr.msk.f32.mxu0 %vm508_vm0, %v317_v2  ;;  %v1645_v2 = vld [vmem:[%s3951_s6 + $0x130] sm:$0xff] }
 0x17c   : > { %v4048_v7 = vpop.f32.mrb[11].mxu1  ;;  %1951 = vmatmul.mubr.f32.gmra.mrb[116].mxu1 %v1637_v3 }
 0x17d   : > { %1955 = vmatprep.mubr.f32.mxu1 %v1641_v4  ;;  %v1664_v4 = vld [vmem:[%s3951_s6 + $0x1c8] sm:$0xff] }
 0x17e   : > { %2850 = vmatmul.mubr.msk.f32.gmra.mrb[90].mxu0 %vm508_vm0, %v320_v6 }
 0x17f   : > { %v4054_v11 = vpop.f32.mrb[12].mxu1  ;;  %2852 = vmatprep.mubr.msk.f32.mxu0 %vm508_vm0, %v323_v8 }
 0x180   : > { %v4058_v13 = vpop.f32.mrb[13].mxu1  ;;  %1956 = vmatmul.mubr.f32.gmra.mrb[118].mxu1 %v1640_v9  ;;  %v1668_v9 = vld [vmem:[%s3951_s6 + $0x1e8] sm:$0xff] }
 0x181   : > { %1960 = vmatprep.mubr.f32.mxu1 %v1644_v10 }
 0x182   : > { %2853 = vmatmul.mubr.msk.f32.gmra.mrb[92].mxu0 %vm508_vm0, %v326_v12  ;;  %v1648_v12 = vld [vmem:[%s3951_s6 + $0x148] sm:$0xff] }
 0x183   : > { %v4064_v16 = vpop.f32.mrb[14].mxu1  ;;  %2855 = vmatprep.mubr.msk.f32.mxu0 %vm508_vm0, %v329_v14 }
 0x184   : > { %v4068_v17 = vpop.f32.mrb[15].mxu1  ;;  %1961 = vmatmul.mubr.f32.gmra.mrb[120].mxu1 %v1643_v15  ;;  %v1651_v15 = vld [vmem:[%s3951_s6 + $0x160] sm:$0xff] }
 0x185   : > { %1965 = vmatprep.mubr.f32.mxu1 %v1647_v61 }
 0x186   : > { %2856 = vmatmul.mubr.msk.f32.gmra.mrb[94].mxu0 %vm508_vm0, %v332_v0 }
 0x187   : > { %v4074_v21 = vpop.f32.mrb[16].mxu1  ;;  %2866 = vmatprep.mubr.msk.f32.mxu0 %vm508_vm0, %v1609_v18 }
 0x188   : > { %v4078_v23 = vpop.f32.mrb[17].mxu1  ;;  %1966 = vmatmul.mubr.f32.gmra.mrb[122].mxu1 %v1646_v19  ;;  %v1671_v19 = vld [vmem:[%s3951_s6 + $0x200] sm:$0xff] }
 0x189   : > { %1970 = vmatprep.mubr.f32.mxu1 %v1650_v20 }
 0x18a   : > { %2867 = vmatmul.mubr.msk.f32.vlgmr.msra.gmra.mrb[96].mxu0 %vm508_vm0, %v1612_v22  ;;  %v1654_v22 = vld [vmem:[%s3951_s6 + $0x178] sm:$0xff] }
 0x18b   : > { %v4084_v27 = vpop.f32.mrb[18].mxu1  ;;  %2869 = vmatprep.mubr.msk.f32.mxu0 %vm508_vm0, %v1615_v24 }
 0x18c   : > { %v4088_v29 = vpop.f32.mrb[19].mxu1  ;;  %1971 = vmatmul.mubr.f32.gmra.mrb[124].mxu1 %v1649_v25  ;;  %v1657_v25 = vld [vmem:[%s3951_s6 + $0x190] sm:$0xff] }
 0x18d   : > { %1975 = vmatprep.mubr.f32.mxu1 %v1653_v26 }
 0x18e   : > { %2870 = vmatmul.mubr.msk.f32.gmra.mrb[98].mxu0 %vm508_vm0, %v1618_v28 }
 0x18f   : > { %v4094_v33 = vpop.f32.mrb[20].mxu1  ;;  %2872 = vmatprep.mubr.msk.f32.mxu0 %vm508_vm0, %v1621_v30 }
 0x190   : > { %v4098_v35 = vpop.f32.mrb[21].mxu1  ;;  %1976 = vmatmul.mubr.f32.gmra.mrb[126].mxu1 %v1652_v31  ;;  %v1674_v31 = vld [vmem:[%s3951_s6 + $0x218] sm:$0xff] }
 0x191   : > { %1980 = vmatprep.mubr.f32.mxu1 %v1656_v32 }
 0x192   : > { %2873 = vmatmul.mubr.msk.f32.gmra.mrb[100].mxu0 %vm508_vm0, %v1624_v34  ;;  %v1660_v34 = vld [vmem:[%s3951_s6 + $0x1a8] sm:$0xff] }
 0x193   : > { %v4104_v41 = vpop.f32.mrb[22].mxu1  ;;  %2875 = vmatprep.mubr.msk.f32.mxu0 %vm508_vm0, %v1627_v36 }
 0x194   : > { %v4108_v44 = vpop.f32.mrb[23].mxu1  ;;  %1981 = vmatmul.mubr.f32.gmra.mrb[128].mxu1 %v1655_v38 }
 0x195   : > { %1985 = vmatprep.mubr.f32.mxu1 %v1659_v40  ;;  %v1663_v40 = vld [vmem:[%s3951_s6 + $0x1c0] sm:$0xff] }
 0x196   : > { %2876 = vmatmul.mubr.msk.f32.gmra.mrb[102].mxu0 %vm508_vm0, %v1630_v42 }
 0x197   : > { %v4114_v50 = vpop.f32.mrb[24].mxu1  ;;  %2878 = vmatprep.mubr.msk.f32.mxu0 %vm508_vm0, %v1633_v46 }
 0x198   : > { %v4118_v53 = vpop.f32.mrb[25].mxu1  ;;  %1986 = vmatmul.mubr.f32.gmra.mrb[130].mxu1 %v1658_v47 }
 0x199   : > { %1990 = vmatprep.mubr.f32.mxu1 %v1662_v48  ;;  %v1677_v48 = vld [vmem:[%s3951_s6 + $0x230] sm:$0xff] }
 0x19a   : > { %2879 = vmatmul.mubr.msk.f32.gmra.mrb[104].mxu0 %vm508_vm0, %v1636_v52 }
 0x19b   : > { %v4124_v59 = vpop.f32.mrb[26].mxu1  ;;  %2881 = vmatprep.mubr.msk.f32.mxu0 %vm508_vm0, %v1639_v54  ;;  %v1666_v54 = vld [vmem:[%s3951_s6 + $0x1d8] sm:$0xff] }
 0x19c   : > { %v4128_v63 = vpop.f32.mrb[27].mxu1  ;;  %1991 = vmatmul.mubr.f32.gmra.mrb[132].mxu1 %v1661_v56 }
 0x19d   : > { %v671_v3 = vpop.f32.mrb[0].mxu0  ;;  %1995 = vmatprep.mubr.f32.mxu1 %v1665_v58 }
 0x19e   : > { %v897_v6 = vadd.f32 %v3998_v39, %v671_v3  ;;  %2882 = vmatmul.mubr.msk.f32.gmra.mrb[106].mxu0 %vm508_vm0, %v1642_v60  ;;  %v673_v8 = vpop.f32.mrb[1].mxu0  ;;  %v1667_v39 = vld [vmem:[%s3951_s6 + $0x1e0] sm:$0xff]  ;;  %v1669_v60 = vld [vmem:[%s3951_s6 + $0x1f0] sm:$0xff] }
 0x19f   : > { %v4135_v10 = vpop.f32.mrb[28].mxu1  ;;  %2884 = vmatprep.mubr.msk.f32.mxu0 %vm508_vm0, %v1645_v2 }
 0x1a0   : > { %v4139_v14 = vpop.f32.mrb[29].mxu1  ;;  %1996 = vmatmul.mubr.f32.gmra.mrb[134].mxu1 %v1664_v4 }
 0x1a1   : > { %v676_v61 = vpop.f32.mrb[2].mxu0  ;;  %2000 = vmatprep.mubr.f32.mxu1 %v1668_v9  ;;  %v1672_v9 = vld [vmem:[%s3951_s6 + $0x208] sm:$0xff] }
 0x1a2   : > { %v902_v0 = vadd.f32 %v3994_v37, %v676_v61  ;;  %2885 = vmatmul.mubr.msk.f32.gmra.mrb[108].mxu0 %vm508_vm0, %v1648_v12  ;;  %v678_v18 = vpop.f32.mrb[3].mxu0  ;;  %v1670_v37 = vld [vmem:[%s3951_s6 + $0x1f8] sm:$0xff]  ;;  %v1675_v61 = vld [vmem:[%s3951_s6 + $0x220] sm:$0xff] }
 0x1a3   : > { %v4146_v20 = vpop.f32.mrb[30].mxu1  ;;  %2887 = vmatprep.mubr.msk.f32.mxu0 %vm508_vm0, %v1651_v15 }
 0x1a4   : > { %v4150_v24 = vpop.f32.mrb[31].mxu1  ;;  %2001 = vmatmul.mubr.f32.gmra.mrb[136].mxu1 %v1667_v39 }
 0x1a5   : > { %v681_v26 = vpop.f32.mrb[4].mxu0  ;;  %2005 = vmatprep.mubr.f32.mxu1 %v1671_v19  ;;  %v1683_v19 = vld [vmem:[%s3951_s6 + $0x260] sm:$0xff] }
 0x1a6   : > { %v907_v28 = vadd.f32 %v4008_v45, %v681_v26  ;;  %2888 = vmatmul.mubr.msk.f32.gmra.mrb[110].mxu0 %vm508_vm0, %v1654_v22  ;;  %v683_v30 = vpop.f32.mrb[5].mxu0  ;;  %v1673_v45 = vld [vmem:[%s3951_s6 + $0x210] sm:$0xff] }
 0x1a7   : > { %v1217_v32 = vpop.f32.mrb[32].mxu1  ;;  %2890 = vmatprep.mubr.msk.f32.mxu0 %vm508_vm0, %v1657_v25  ;;  %v1678_v25 = vld [vmem:[%s3951_s6 + $0x238] sm:$0xff] }
 0x1a8   : > { %v4159_v36 = vadd.f32 %v1217_v32, %v897_v6  ;;  %v1219_v38 = vpop.f32.mrb[33].mxu1  ;;  %2006 = vmatmul.mubr.f32.gmra.mrb[138].mxu1 %v1670_v37  ;;  %v1680_v6 = vld [vmem:[%s3951_s6 + $0x248] sm:$0xff] }
 0x1a9   : > { %v686_v42 = vpop.f32.mrb[6].mxu0  ;;  %2010 = vmatprep.mubr.f32.mxu1 %v1674_v31 }
 0x1aa   : > { %v912_v46 = vadd.f32 %v4004_v43, %v686_v42  ;;  %2891 = vmatmul.mubr.msk.f32.gmra.mrb[112].mxu0 %vm508_vm0, %v1660_v34  ;;  %v688_v47 = vpop.f32.mrb[7].mxu0  ;;  %v1676_v43 = vld [vmem:[%s3951_s6 + $0x228] sm:$0xff]  ;;  %v1686_v34 = vld [vmem:[%s3951_s6 + $0x278] sm:$0xff] }
 0x1ab   : > { %v1222_v52 = vpop.f32.mrb[34].mxu1  ;;  %2893 = vmatprep.mubr.msk.f32.mxu0 %vm508_vm0, %v1663_v40  ;;  %v1684_v40 = vld [vmem:[%s3951_s6 + $0x268] sm:$0xff] }
 0x1ac   : > { %v4168_v56 = vadd.f32 %v1222_v52, %v902_v0  ;;  %v1224_v58 = vpop.f32.mrb[35].mxu1  ;;  %2011 = vmatmul.mubr.f32.gmra.mrb[140].mxu1 %v1673_v45 }
 0x1ad   : > { %v691_v2 = vpop.f32.mrb[8].mxu0  ;;  %2015 = vmatprep.mubr.f32.mxu1 %v1677_v48 }
 0x1ae   : > { %v917_v3 = vadd.f32 %v4018_v51, %v691_v2  ;;  %2894 = vmatmul.mubr.msk.f32.gmra.mrb[114].mxu0 %vm508_vm0, %v1666_v54  ;;  %v693_v4 = vpop.f32.mrb[9].mxu0  ;;  %v1679_v51 = vld [vmem:[%s3951_s6 + $0x240] sm:$0xff]  ;;  %v1689_v54 = vld [vmem:[%s3951_s6 + $0x290] sm:$0xff] }
 0x1af   : > { %v1227_v8 = vpop.f32.mrb[36].mxu1  ;;  %2896 = vmatprep.mubr.msk.f32.mxu0 %vm508_vm0, %v1669_v60  ;;  %v1690_v60 = vld [vmem:[%s3951_s6 + $0x298] sm:$0xff] }
 0x1b0   : > { %v4177_v12 = vadd.f32 %v1227_v8, %v907_v28  ;;  %v1229_v15 = vpop.f32.mrb[37].mxu1  ;;  %2016 = vmatmul.mubr.f32.gmra.mrb[142].mxu1 %v1676_v43  ;;  %v1681_v28 = vld [vmem:[%s3951_s6 + $0x250] sm:$0xff] }
 0x1b1   : > { %v696_v39 = vpop.f32.mrb[10].mxu0  ;;  %2020 = vmatprep.mubr.f32.mxu1 %v1680_v6 }
 0x1b2   : > { %v922_v0 = vadd.f32 %v4014_v49, %v696_v39  ;;  %2897 = vmatmul.mubr.msk.f32.gmra.mrb[116].mxu0 %vm508_vm0, %v1672_v9  ;;  %v698_v18 = vpop.f32.mrb[11].mxu0  ;;  %v1682_v49 = vld [vmem:[%s3951_s6 + $0x258] sm:$0xff]  ;;  %v1692_v9 = vld [vmem:[%s3951_s6 + $0x2a8] sm:$0xff] }
 0x1b3   : > { %v1232_v22 = vpop.f32.mrb[38].mxu1  ;;  %2899 = vmatprep.mubr.msk.f32.mxu0 %vm508_vm0, %v1675_v61  ;;  %v1696_v61 = vld [vmem:[%s3951_s6 + $0x2c8] sm:$0xff] }
 0x1b4   : > { %v4186_v26 = vadd.f32 %v1232_v22, %v912_v46  ;;  %v1234_v37 = vpop.f32.mrb[39].mxu1  ;;  %2021 = vmatmul.mubr.f32.gmra.mrb[144].mxu1 %v1679_v51  ;;  %v1687_v46 = vld [vmem:[%s3951_s6 + $0x280] sm:$0xff] }
 0x1b5   : > { %v701_v30 = vpop.f32.mrb[12].mxu0  ;;  %2025 = vmatprep.mubr.f32.mxu1 %v1683_v19  ;;  %v1691_v19 = vld [vmem:[%s3951_s6 + $0x2a0] sm:$0xff] }
 0x1b6   : > { %v927_v31 = vadd.f32 %v4028_v57, %v701_v30  ;;  %2900 = vmatmul.mubr.msk.f32.gmra.mrb[118].mxu0 %vm508_vm0, %v1678_v25  ;;  %v703_v32 = vpop.f32.mrb[13].mxu0  ;;  %v1685_v57 = vld [vmem:[%s3951_s6 + $0x270] sm:$0xff]  ;;  %v1695_v25 = vld [vmem:[%s3951_s6 + $0x2c0] sm:$0xff] }
 0x1b7   : > { %v1237_v38 = vpop.f32.mrb[40].mxu1  ;;  %2902 = vmatprep.mubr.msk.f32.mxu0 %vm508_vm0, %v1681_v28  ;;  %v1702_v28 = vld [vmem:[%s3951_s6 + $0x2f8] sm:$0xff] }
 0x1b8   : > { %v4195_v42 = vadd.f32 %v1237_v38, %v917_v3  ;;  %v1239_v45 = vpop.f32.mrb[41].mxu1  ;;  %2026 = vmatmul.mubr.f32.gmra.mrb[146].mxu1 %v1682_v49  ;;  %v1693_v3 = vld [vmem:[%s3951_s6 + $0x2b0] sm:$0xff]  ;;  %v1694_v32 = vld [vmem:[%s3951_s6 + $0x2b8] sm:$0xff] }
 0x1b9   : > { %v706_v47 = vpop.f32.mrb[14].mxu0  ;;  %2030 = vmatprep.mubr.f32.mxu1 %v1686_v34  ;;  %v1698_v38 = vld [vmem:[%s3951_s6 + $0x2d8] sm:$0xff] }
 0x1ba   : > { %v932_v48 = vadd.f32 %v4024_v55, %v706_v47  ;;  %2903 = vmatmul.mubr.msk.f32.gmra.mrb[120].mxu0 %vm508_vm0, %v1684_v40  ;;  %v708_v52 = vpop.f32.mrb[15].mxu0  ;;  %v1688_v55 = vld [vmem:[%s3951_s6 + $0x288] sm:$0xff] }
 0x1bb   : > { %v1242_v58 = vpop.f32.mrb[42].mxu1  ;;  %2905 = vmatprep.mubr.msk.f32.mxu0 %vm508_vm0, %v1687_v46 }
 0x1bc   : > { %v4204_v2 = vadd.f32 %v1242_v58, %v922_v0  ;;  %v1244_v43 = vpop.f32.mrb[43].mxu1  ;;  %2031 = vmatmul.mubr.f32.gmra.mrb[148].mxu1 %v1685_v57  ;;  %v1699_v0 = vld [vmem:[%s3951_s6 + $0x2e0] sm:$0xff]  ;;  %v1697_v57 = vld [vmem:[%s3951_s6 + $0x2d0] sm:$0xff] }
 0x1bd   : > { %v711_v4 = vpop.f32.mrb[16].mxu0  ;;  %2035 = vmatprep.mubr.f32.mxu1 %v1689_v54  ;;  %v1701_v54 = vld [vmem:[%s3951_s6 + $0x2f0] sm:$0xff] }
 0x1be   : > { %v937_v6 = vadd.f32 %v4038_v1, %v711_v4  ;;  %2906 = vmatmul.mubr.msk.f32.gmra.mrb[122].mxu0 %vm508_vm0, %v1690_v60  ;;  %v713_v8 = vpop.f32.mrb[17].mxu0 }
 0x1bf   : > { %v1247_v15 = vpop.f32.mrb[44].mxu1  ;;  %2908 = vmatprep.mubr.msk.f32.mxu0 %vm508_vm0, %v1693_v3  ;;  %v1700_v3 = vld [vmem:[%s3951_s6 + $0x2e8] sm:$0xff] }
 0x1c0   : > { %v4213_v39 = vadd.f32 %v1247_v15, %v927_v31  ;;  %v1249_v51 = vpop.f32.mrb[45].mxu1  ;;  %2036 = vmatmul.mubr.f32.gmra.mrb[150].mxu1 %v1688_v55 }
 0x1c1   : > { %v716_v18 = vpop.f32.mrb[18].mxu0  ;;  %2040 = vmatprep.mubr.f32.mxu1 %v1692_v9 }
 0x1c2   : > { %v942_v1 = vadd.f32 %v4034_v62, %v716_v18  ;;  %2909 = vmatmul.mubr.msk.f32.gmra.mrb[124].mxu0 %vm508_vm0, %v1696_v61  ;;  %v718_v22 = vpop.f32.mrb[19].mxu0 }
 0x1c3   : > { %v1252_v37 = vpop.f32.mrb[46].mxu1  ;;  %2911 = vmatprep.mubr.msk.f32.mxu0 %vm508_vm0, %v1699_v0 }
 0x1c4   : > { %v4222_v30 = vadd.f32 %v1252_v37, %v932_v48  ;;  %v1254_v49 = vpop.f32.mrb[47].mxu1  ;;  %2041 = vmatmul.mubr.f32.gmra.mrb[152].mxu1 %v1691_v19 }
 0x1c5   : > { %v721_v31 = vpop.f32.mrb[20].mxu0  ;;  %2045 = vmatprep.mubr.f32.mxu1 %v1695_v25 }
 0x1c6   : > { %v947_v34 = vadd.f32 %v4048_v7, %v721_v31  ;;  %v723_v62 = vpop.f32.mrb[21].mxu0  ;;  %2912 = vmatmul.mubr.msk.f32.gmra.mrb[126].mxu0 %vm508_vm0, %v1702_v28 }
 0x1c7   : > { %v1257_v40 = vpop.f32.mrb[48].mxu1 }
 0x1c8   : > { %v4228_v45 = vadd.f32 %v1257_v40, %v937_v6  ;;  %v1259_v46 = vpop.f32.mrb[49].mxu1  ;;  %2046 = vmatmul.mubr.f32.gmra.mrb[154].mxu1 %v1694_v32 }
 0x1c9   : > { %v726_v47 = vpop.f32.mrb[22].mxu0  ;;  %2050 = vmatprep.mubr.f32.mxu1 %v1698_v38 }
 0x1ca   : > { %v952_v48 = vadd.f32 %v4044_v5, %v726_v47  ;;  %v728_v52 = vpop.f32.mrb[23].mxu0 }
 0x1cb   : > { %v1262_v58 = vpop.f32.mrb[50].mxu1 }
 0x1cc   : > { %v4233_v60 = vadd.f32 %v1262_v58, %v942_v1  ;;  %v1264_v7 = vpop.f32.mrb[51].mxu1  ;;  %2051 = vmatmul.mubr.f32.gmra.mrb[156].mxu1 %v1697_v57 }
 0x1cd   : > { %v731_v43 = vpop.f32.mrb[24].mxu0  ;;  %2055 = vmatprep.mubr.f32.mxu1 %v1701_v54 }
 0x1ce   : > { %v957_v4 = vadd.f32 %v4058_v13, %v731_v43  ;;  %v733_v55 = vpop.f32.mrb[25].mxu0 }
 0x1cf   : > { %v1267_v6 = vpop.f32.mrb[52].mxu1 }
 0x1d0   : > { %v4237_v8 = vadd.f32 %v1267_v6, %v947_v34  ;;  %v1269_v9 = vpop.f32.mrb[53].mxu1  ;;  %2056 = vmatmul.mubr.f32.gmra.mrb[158].mxu1 %v1700_v3 }
 0x1d1   : > { %v736_v15 = vpop.f32.mrb[26].mxu0 }
 0x1d2   : > { %v962_v5 = vadd.f32 %v4054_v11, %v736_v15  ;;  %v738_v61 = vpop.f32.mrb[27].mxu0 }
 0x1d3   : > { %v1272_v51 = vpop.f32.mrb[54].mxu1 }
 0x1d4   : > { %v4240_v0 = vadd.f32 %v1272_v51, %v952_v48  ;;  %v1274_v18 = vpop.f32.mrb[55].mxu1 }
 0x1d5   : > { %v741_v19 = vpop.f32.mrb[28].mxu0 }
 0x1d6   : > { %v967_v1 = vadd.f32 %v4068_v17, %v741_v19  ;;  %v743_v22 = vpop.f32.mrb[29].mxu0 }
 0x1d7   : > { %v1277_v25 = vpop.f32.mrb[56].mxu1 }
 0x1d8   : > { %v4243_v13 = vadd.f32 %v1277_v25, %v957_v4  ;;  %v1279_v37 = vpop.f32.mrb[57].mxu1 }
 0x1d9   : > { %v746_v28 = vpop.f32.mrb[30].mxu0 }
 0x1da   : > { %v972_v49 = vadd.f32 %v4064_v16, %v746_v28  ;;  %v748_v31 = vpop.f32.mrb[31].mxu0 }
 0x1db   : > { %v1282_v32 = vpop.f32.mrb[58].mxu1 }
 0x1dc   : > { %v4246_v34 = vadd.f32 %v1282_v32, %v962_v5  ;;  %v1284_v11 = vpop.f32.mrb[59].mxu1 }
 0x1dd   : > { %v751_v62 = vpop.f32.mrb[32].mxu0 }
 0x1de   : > { %v977_v38 = vadd.f32 %v4078_v23, %v751_v62  ;;  %v753_v40 = vpop.f32.mrb[33].mxu0 }
 0x1df   : > { %v1287_v46 = vpop.f32.mrb[60].mxu1 }
 0x1e0   : > { %v4249_v47 = vadd.f32 %v1287_v46, %v967_v1  ;;  %v1289_v17 = vpop.f32.mrb[61].mxu1 }
 0x1e1   : > { %v756_v57 = vpop.f32.mrb[34].mxu0 }
 0x1e2   : > { %v982_v48 = vadd.f32 %v4074_v21, %v756_v57  ;;  %v758_v52 = vpop.f32.mrb[35].mxu0 }
 0x1e3   : > { %v1292_v54 = vpop.f32.mrb[62].mxu1 }
 0x1e4   : > { %v4252_v58 = vadd.f32 %v1292_v54, %v972_v49  ;;  %v1294_v16 = vpop.f32.mrb[63].mxu1 }
 0x1e5   : > { %v761_v7 = vpop.f32.mrb[36].mxu0 }
 0x1e6   : > { %v987_v43 = vadd.f32 %v4088_v29, %v761_v7  ;;  %v763_v3 = vpop.f32.mrb[37].mxu0 }
 0x1e7   : > { %v1297_v4 = vpop.f32.mrb[64].mxu1 }
 0x1e8   : > { %v4255_v55 = vadd.f32 %v1297_v4, %v977_v38  ;;  %v1299_v23 = vpop.f32.mrb[65].mxu1 }
 0x1e9   : > { %v766_v6 = vpop.f32.mrb[38].mxu0 }
 0x1ea   : > { %v992_v9 = vadd.f32 %v4084_v27, %v766_v6  ;;  %v768_v15 = vpop.f32.mrb[39].mxu0 }
 0x1eb   : > { %v1302_v5 = vpop.f32.mrb[66].mxu1 }
 0x1ec   : > { %v4258_v61 = vadd.f32 %v1302_v5, %v982_v48  ;;  %v1304_v21 = vpop.f32.mrb[67].mxu1 }
 0x1ed   : > { %v771_v51 = vpop.f32.mrb[40].mxu0 }
 0x1ee   : > { %v997_v18 = vadd.f32 %v4098_v35, %v771_v51  ;;  %v773_v19 = vpop.f32.mrb[41].mxu0 }
 0x1ef   : > { %v1307_v1 = vpop.f32.mrb[68].mxu1 }
 0x1f0   : > { %v4261_v22 = vadd.f32 %v1307_v1, %v987_v43  ;;  %v1309_v29 = vpop.f32.mrb[69].mxu1 }
 0x1f1   : > { %v776_v25 = vpop.f32.mrb[42].mxu0 }
 0x1f2   : > { %v1002_v37 = vadd.f32 %v4094_v33, %v776_v25  ;;  %v778_v28 = vpop.f32.mrb[43].mxu0 }
 0x1f3   : > { %v1312_v49 = vpop.f32.mrb[70].mxu1 }
 0x1f4   : > { %v4264_v31 = vadd.f32 %v1312_v49, %v992_v9  ;;  %v1314_v27 = vpop.f32.mrb[71].mxu1 }
 0x1f5   : > { %v781_v32 = vpop.f32.mrb[44].mxu0 }
 0x1f6   : > { %v1007_v11 = vadd.f32 %v4108_v44, %v781_v32  ;;  %v783_v62 = vpop.f32.mrb[45].mxu0 }
 0x1f7   : > { %v1317_v38 = vpop.f32.mrb[72].mxu1 }
 0x1f8   : > { %v4267_v40 = vadd.f32 %v1317_v38, %v997_v18  ;;  %v1319_v35 = vpop.f32.mrb[73].mxu1 }
 0x1f9   : > { %v786_v46 = vpop.f32.mrb[46].mxu0 }
 0x1fa   : > { %v1012_v17 = vadd.f32 %v4104_v41, %v786_v46  ;;  %v788_v57 = vpop.f32.mrb[47].mxu0 }
 0x1fb   : > { %v1322_v48 = vpop.f32.mrb[74].mxu1 }
 0x1fc   : > { %v4270_v52 = vadd.f32 %v1322_v48, %v1002_v37  ;;  %v1324_v33 = vpop.f32.mrb[75].mxu1 }
 0x1fd   : > { %v791_v54 = vpop.f32.mrb[48].mxu0 }
 0x1fe   : > { %v1017_v16 = vadd.f32 %v4118_v53, %v791_v54  ;;  %v793_v7 = vpop.f32.mrb[49].mxu0 }
 0x1ff   : > { %v1327_v43 = vpop.f32.mrb[76].mxu1 }
 0x200   : > { %v4273_v3 = vadd.f32 %v1327_v43, %v1007_v11  ;;  %v1329_v44 = vpop.f32.mrb[77].mxu1 }
 0x201   : > { %v796_v4 = vpop.f32.mrb[50].mxu0 }
 0x202   : > { %v1022_v23 = vadd.f32 %v4114_v50, %v796_v4  ;;  %v798_v6 = vpop.f32.mrb[51].mxu0 }
 0x203   : > { %v1332_v9 = vpop.f32.mrb[78].mxu1 }
 0x204   : > { %v4276_v15 = vadd.f32 %v1332_v9, %v1012_v17  ;;  %v1334_v41 = vpop.f32.mrb[79].mxu1 }
 0x205   : > { %v801_v5 = vpop.f32.mrb[52].mxu0 }
 0x206   : > { %v1027_v21 = vadd.f32 %v4128_v63, %v801_v5  ;;  %v803_v51 = vpop.f32.mrb[53].mxu0 }
 0x207   : > { %v1337_v18 = vpop.f32.mrb[80].mxu1 }
 0x208   : > { %v4279_v19 = vadd.f32 %v1337_v18, %v1017_v16  ;;  %v1339_v53 = vpop.f32.mrb[81].mxu1 }
 0x209   : > { %v806_v1 = vpop.f32.mrb[54].mxu0 }
 0x20a   : > { %v1032_v29 = vadd.f32 %v4124_v59, %v806_v1  ;;  %v808_v25 = vpop.f32.mrb[55].mxu0 }
 0x20b   : > { %v1342_v37 = vpop.f32.mrb[82].mxu1 }
 0x20c   : > { %v4282_v28 = vadd.f32 %v1342_v37, %v1022_v23  ;;  %v1344_v50 = vpop.f32.mrb[83].mxu1 }
 0x20d   : > { %v811_v49 = vpop.f32.mrb[56].mxu0 }
 0x20e   : > { %v1037_v27 = vadd.f32 %v4139_v14, %v811_v49  ;;  %v813_v32 = vpop.f32.mrb[57].mxu0 }
 0x20f   : > { %v1347_v11 = vpop.f32.mrb[84].mxu1 }
 0x210   : > { %v4285_v62 = vadd.f32 %v1347_v11, %v1027_v21  ;;  %v1349_v63 = vpop.f32.mrb[85].mxu1 }
 0x211   : > { %v816_v38 = vpop.f32.mrb[58].mxu0 }
 0x212   : > { %v1042_v35 = vadd.f32 %v4135_v10, %v816_v38  ;;  %v818_v46 = vpop.f32.mrb[59].mxu0 }
 0x213   : > { %v1352_v17 = vpop.f32.mrb[86].mxu1 }
 0x214   : > { %v4288_v57 = vadd.f32 %v1352_v17, %v1032_v29  ;;  %v1354_v59 = vpop.f32.mrb[87].mxu1 }
 0x215   : > { %v821_v48 = vpop.f32.mrb[60].mxu0 }
 0x216   : > { %v1047_v33 = vadd.f32 %v4150_v24, %v821_v48  ;;  %v823_v54 = vpop.f32.mrb[61].mxu0 }
 0x217   : > { %v1357_v16 = vpop.f32.mrb[88].mxu1 }
 0x218   : > { %v4291_v7 = vadd.f32 %v1357_v16, %v1037_v27  ;;  %v1359_v14 = vpop.f32.mrb[89].mxu1 }
 0x219   : > { %v826_v43 = vpop.f32.mrb[62].mxu0 }
 0x21a   : > { %v1052_v44 = vadd.f32 %v4146_v20, %v826_v43  ;;  %v828_v4 = vpop.f32.mrb[63].mxu0 }
 0x21b   : > { %v1362_v23 = vpop.f32.mrb[90].mxu1 }
 0x21c   : > { %v4294_v6 = vadd.f32 %v1362_v23, %v1042_v35  ;;  %v1364_v10 = vpop.f32.mrb[91].mxu1 }
 0x21d   : > { %v2812_v9 = vpop.f32.mrb[64].mxu0 }
 0x21e   : > { %v4297_v41 = vadd.f32 %v2812_v9, %v4168_v56  ;;  %v1442_v5 = vpop.f32.mrb[65].mxu0 }
 0x21f   : > { %v1367_v21 = vpop.f32.mrb[92].mxu1  ;;  %v4300_v24 = vadd.f32 %v1442_v5, %v4159_v36 }
 0x220   : > { %v4302_v51 = vadd.f32 %v1367_v21, %v1047_v33  ;;  %v1369_v18 = vpop.f32.mrb[93].mxu1 }
 0x221   : > { %v2815_v53 = vpop.f32.mrb[66].mxu0 }
 0x222   : > { %v4305_v20 = vadd.f32 %v2815_v53, %v4186_v26  ;;  %v1452_v1 = vpop.f32.mrb[67].mxu0 }
 0x223   : > { %v1372_v29 = vpop.f32.mrb[94].mxu1  ;;  %v4308_v25 = vadd.f32 %v1452_v1, %v4177_v12 }
 0x224   : > { %v4310_v37 = vadd.f32 %v1372_v29, %v1052_v44  ;;  %v1374_v56 = vpop.f32.mrb[95].mxu1 }
 0x225   : > { %v2818_v50 = vpop.f32.mrb[68].mxu0 }
 0x226   : > { %v4313_v49 = vadd.f32 %v2818_v50, %v4204_v2  ;;  %v1462_v36 = vpop.f32.mrb[69].mxu0 }
 0x227   : > { %v4316_v27 = vadd.f32 %v1462_v36, %v4195_v42  ;;  %v4318_v32 = vpop.f32.mrb[96].mxu1 }
 0x228   : > { %v1904_v26 = vpop.f32.mrb[97].mxu1 }
 0x229   : > { %v2821_v11 = vpop.f32.mrb[70].mxu0 }
 0x22a   : > { %v4321_v63 = vadd.f32 %v2821_v11, %v4222_v30  ;;  %v1472_v12 = vpop.f32.mrb[71].mxu0 }
 0x22b   : > { %v4324_v38 = vadd.f32 %v1472_v12, %v4213_v39  ;;  %v4326_v35 = vpop.f32.mrb[98].mxu1 }
 0x22c   : > { %v1909_v46 = vpop.f32.mrb[99].mxu1 }
 0x22d   : > { %v2824_v2 = vpop.f32.mrb[72].mxu0 }
 0x22e   : > { %v4329_v17 = vadd.f32 %v2824_v2, %v4233_v60  ;;  %v1482_v42 = vpop.f32.mrb[73].mxu0 }
 0x22f   : > { %v4332_v59 = vadd.f32 %v1482_v42, %v4228_v45  ;;  %v4334_v48 = vpop.f32.mrb[100].mxu1 }
 0x230   : > { %v1914_v33 = vpop.f32.mrb[101].mxu1 }
 0x231   : > { %v2827_v30 = vpop.f32.mrb[74].mxu0 }
 0x232   : > { %v4337_v54 = vadd.f32 %v2827_v30, %v4240_v0  ;;  %v1492_v39 = vpop.f32.mrb[75].mxu0 }
 0x233   : > { %v4340_v16 = vadd.f32 %v1492_v39, %v4237_v8  ;;  %v4342_v14 = vpop.f32.mrb[102].mxu1 }
 0x234   : > { %v1919_v43 = vpop.f32.mrb[103].mxu1 }
 0x235   : > { %v2830_v60 = vpop.f32.mrb[76].mxu0 }
 0x236   : > { %v4345_v44 = vadd.f32 %v2830_v60, %v4246_v34  ;;  %v1502_v45 = vpop.f32.mrb[77].mxu0 }
 0x237   : > { %v4348_v4 = vadd.f32 %v1502_v45, %v4243_v13  ;;  %v4350_v23 = vpop.f32.mrb[104].mxu1 }
 0x238   : > { %v1924_v10 = vpop.f32.mrb[105].mxu1 }
 0x239   : > { %v2833_v0 = vpop.f32.mrb[78].mxu0 }
 0x23a   : > { %v4353_v9 = vadd.f32 %v2833_v0, %v4252_v58  ;;  %v1512_v8 = vpop.f32.mrb[79].mxu0 }
 0x23b   : > { %v4356_v5 = vadd.f32 %v1512_v8, %v4249_v47  ;;  %v4358_v21 = vpop.f32.mrb[106].mxu1 }
 0x23c   : > { %v1929_v18 = vpop.f32.mrb[107].mxu1 }
 0x23d   : > { %v2836_v34 = vpop.f32.mrb[80].mxu0 }
 0x23e   : > { %v4361_v53 = vadd.f32 %v2836_v34, %v4258_v61  ;;  %v1522_v13 = vpop.f32.mrb[81].mxu0 }
 0x23f   : > { %v4364_v1 = vadd.f32 %v1522_v13, %v4255_v55  ;;  %v4366_v29 = vpop.f32.mrb[108].mxu1 }
 0x240   : > { %v1934_v56 = vpop.f32.mrb[109].mxu1 }
 0x241   : > { %v2839_v58 = vpop.f32.mrb[82].mxu0 }
 0x242   : > { %v4369_v50 = vadd.f32 %v2839_v58, %v4264_v31  ;;  %v1532_v47 = vpop.f32.mrb[83].mxu0 }
 0x243   : > { %v4372_v36 = vadd.f32 %v1532_v47, %v4261_v22  ;;  %v4374_v26 = vpop.f32.mrb[110].mxu1 }
 0x244   : > { %v1939_v11 = vpop.f32.mrb[111].mxu1 }
 0x245   : > { %v2842_v61 = vpop.f32.mrb[84].mxu0 }
 0x246   : > { %v4377_v12 = vadd.f32 %v2842_v61, %v4270_v52  ;;  %v1542_v55 = vpop.f32.mrb[85].mxu0 }
 0x247   : > { %v4380_v46 = vadd.f32 %v1542_v55, %v4267_v40  ;;  %v4382_v2 = vpop.f32.mrb[112].mxu1 }
 0x248   : > { %v1944_v42 = vpop.f32.mrb[113].mxu1 }
 0x249   : > { %v2845_v31 = vpop.f32.mrb[86].mxu0 }
 0x24a   : > { %v4385_v33 = vadd.f32 %v2845_v31, %v4276_v15  ;;  %v1552_v22 = vpop.f32.mrb[87].mxu0 }
 0x24b   : > { %v4388_v30 = vadd.f32 %v1552_v22, %v4273_v3  ;;  %v4390_v39 = vpop.f32.mrb[114].mxu1 }
 0x24c   : > { %v1949_v43 = vpop.f32.mrb[115].mxu1 }
 0x24d   : > { %v2848_v52 = vpop.f32.mrb[88].mxu0  ;;  %v4428_v43 = vld [vmem:[#allocation7] ss:$0 sm:$0xff] }
 0x24e   : > { %v4393_v60 = vadd.f32 %v2848_v52, %v4282_v28  ;;  %v1562_v40 = vpop.f32.mrb[89].mxu0 }
 0x24f   : > { %v4396_v45 = vadd.f32 %v1562_v40, %v4279_v19  ;;  %v4398_v10 = vpop.f32.mrb[116].mxu1 }
 0x250   : > { %v1954_v0 = vpop.f32.mrb[117].mxu1 }
 0x251   : > { %v2851_v15 = vpop.f32.mrb[90].mxu0 }
 0x252   : > { %v4401_v8 = vadd.f32 %v2851_v15, %v4288_v57  ;;  %v1572_v3 = vpop.f32.mrb[91].mxu0 }
 0x253   : > { %v4404_v18 = vadd.f32 %v1572_v3, %v4285_v62  ;;  %v4406_v34 = vpop.f32.mrb[118].mxu1 }
 0x254   : > { %v1959_v28 = vpop.f32.mrb[119].mxu1 }
 0x255   : > { %v2854_v13 = vpop.f32.mrb[92].mxu0 }
 0x256   : > { %v4409_v19 = vadd.f32 %v2854_v13, %v4294_v6  ;;  %v1582_v56 = vpop.f32.mrb[93].mxu0 }
 0x257   : > { %v4412_v58 = vadd.f32 %v1582_v56, %v4291_v7  ;;  %v4414_v47 = vpop.f32.mrb[120].mxu1 }
 0x258   : > { %v1964_v57 = vpop.f32.mrb[121].mxu1 }
 0x259   : > { %v2857_v11 = vpop.f32.mrb[94].mxu0 }
 0x25a   : > { %v4417_v61 = vadd.f32 %v2857_v11, %v4310_v37  ;;  %v1592_v62 = vpop.f32.mrb[95].mxu0 }
 0x25b   : > { %v4420_v55 = vadd.f32 %v1592_v62, %v4302_v51  ;;  %v4422_v42 = vpop.f32.mrb[122].mxu1 }
 0x25c   : > { %v1969_v6 = vpop.f32.mrb[123].mxu1 }
 0x25d   : > { %v2868_v31 = vpop.f32.mrb[96].mxu0 }
 0x25e   : > { %v2133_v7 = vadd.f32 %v2868_v31, %v4326_v35  ;;  %v2127_v22 = vpop.f32.mrb[97].mxu0 }
 0x25f   : > { %v4430_v52 = vpop.f32.mrb[124].mxu1  ;;  %v2128_v37 = vadd.f32 %v2127_v22, %v4318_v32 }
 0x260   : > { %v2287_v40 = vadd.f32 %v2133_v7, %v4297_v41  ;;  %v1974_v51 = vpop.f32.mrb[125].mxu1 }
 0x261   : > { %v2286_v0 = vadd.f32 %v2128_v37, %v4300_v24  ;;  %v2871_v15 = vpop.f32.mrb[98].mxu0 }
 0x262   : > { %v2326_v3 = vadd.f32 %v4428_v43, %v2287_v40  ;;  %v2143_v28 = vadd.f32 %v2871_v15, %v4342_v14  ;;  %v2137_v13 = vpop.f32.mrb[99].mxu0 }
 0x263   : > { %v2325_v35 = vadd.f32 %v4428_v43, %v2286_v0  ;;  %v4438_v56 = vpop.f32.mrb[126].mxu1  ;;  %v2138_v57 = vadd.f32 %v2137_v13, %v4334_v48 }
 0x264   : > { %2358 = vst [vmem:[%s4441_s11 + $0x8] sm:$0xff] %v2326_v3  ;;  %v2289_v41 = vadd.f32 %v2143_v28, %v4305_v20  ;;  %v1979_v24 = vpop.f32.mrb[127].mxu1 }
 0x265   : > { %2357 = vst [vmem:[%s4441_s11] sm:$0xff] %v2325_v35  ;;  %v2288_v32 = vadd.f32 %v2138_v57, %v4308_v25  ;;  %v2874_v14 = vpop.f32.mrb[100].mxu0 }
 0x266   : > { %v2328_v11 = vadd.f32 %v4428_v43, %v2289_v41  ;;  %v2153_v62 = vadd.f32 %v2874_v14, %v4358_v21  ;;  %v2147_v6 = vpop.f32.mrb[101].mxu0 }
 0x267   : > { %v2327_v48 = vadd.f32 %v4428_v43, %v2288_v32  ;;  %v4450_v31 = vpop.f32.mrb[128].mxu1  ;;  %v2148_v7 = vadd.f32 %v2147_v6, %v4350_v23 }
 0x268   : > { %2360 = vst [vmem:[%s4441_s11 + $0x18] sm:$0xff] %v2328_v11  ;;  %v2291_v20 = vadd.f32 %v2153_v62, %v4313_v49  ;;  %v1984_v22 = vpop.f32.mrb[129].mxu1 }
 0x269   : > { %2359 = vst [vmem:[%s4441_s11 + $0x10] sm:$0xff] %v2327_v48  ;;  %v2290_v25 = vadd.f32 %v2148_v7, %v4316_v27  ;;  %v2877_v37 = vpop.f32.mrb[102].mxu0 }
 0x26a   : > { %v2330_v40 = vadd.f32 %v4428_v43, %v2291_v20  ;;  %v2163_v21 = vadd.f32 %v2877_v37, %v4374_v26  ;;  %v2157_v51 = vpop.f32.mrb[103].mxu0 }
 0x26b   : > { %v2329_v0 = vadd.f32 %v4428_v43, %v2290_v25  ;;  %v1987_v15 = vpop.f32.mrb[130].mxu1  ;;  %v2158_v23 = vadd.f32 %v2157_v51, %v4366_v29 }
 0x26c   : > { %2362 = vst [vmem:[%s4441_s11 + $0x28] sm:$0xff] %v2330_v40  ;;  %v2293_v49 = vadd.f32 %v2163_v21, %v4321_v63  ;;  %v1989_v3 = vpop.f32.mrb[131].mxu1 }
 0x26d   : > { %2361 = vst [vmem:[%s4441_s11 + $0x20] sm:$0xff] %v2329_v0  ;;  %v2292_v27 = vadd.f32 %v2158_v23, %v4324_v38  ;;  %v2880_v28 = vpop.f32.mrb[104].mxu0 }
 0x26e   : > { %v2332_v13 = vadd.f32 %v4428_v43, %v2293_v49  ;;  %v2173_v26 = vadd.f32 %v2880_v28, %v4390_v39  ;;  %v2167_v35 = vpop.f32.mrb[105].mxu0 }
 0x26f   : > { %v2331_v57 = vadd.f32 %v4428_v43, %v2292_v27  ;;  %v1992_v41 = vpop.f32.mrb[132].mxu1  ;;  %v2168_v29 = vadd.f32 %v2167_v35, %v4382_v2 }
 0x270   : > { %2364 = vst [vmem:[%s4441_s11 + $0x38] sm:$0xff] %v2332_v13  ;;  %v2295_v63 = vadd.f32 %v2173_v26, %v4329_v17  ;;  %v1994_v24 = vpop.f32.mrb[133].mxu1 }
 0x271   : > { %2363 = vst [vmem:[%s4441_s11 + $0x30] sm:$0xff] %v2331_v57  ;;  %v2294_v38 = vadd.f32 %v2168_v29, %v4332_v59  ;;  %v2883_v32 = vpop.f32.mrb[106].mxu0 }
 0x272   : > { %v2334_v14 = vadd.f32 %v4428_v43, %v2295_v63  ;;  %v2183_v39 = vadd.f32 %v2883_v32, %v4406_v34  ;;  %v2177_v11 = vpop.f32.mrb[107].mxu0 }
 0x273   : > { %v2333_v62 = vadd.f32 %v4428_v43, %v2294_v38  ;;  %v1997_v6 = vpop.f32.mrb[134].mxu1  ;;  %v2178_v2 = vadd.f32 %v2177_v11, %v4398_v10 }
 0x274   : > { %2366 = vst [vmem:[%s4441_s11 + $0x48] sm:$0xff] %v2334_v14  ;;  %v2297_v17 = vadd.f32 %v2183_v39, %v4337_v54  ;;  %v1999_v48 = vpop.f32.mrb[135].mxu1 }
 0x275   : > { %2365 = vst [vmem:[%s4441_s11 + $0x40] sm:$0xff] %v2333_v62  ;;  %v2296_v59 = vadd.f32 %v2178_v2, %v4340_v16  ;;  %v2886_v7 = vpop.f32.mrb[108].mxu0 }
 0x276   : > { %v2336_v20 = vadd.f32 %v4428_v43, %v2297_v17  ;;  %v2193_v34 = vadd.f32 %v2886_v7, %v4422_v42  ;;  %v2187_v22 = vpop.f32.mrb[109].mxu0 }
 0x277   : > { %v2335_v25 = vadd.f32 %v4428_v43, %v2296_v59  ;;  %v2002_v37 = vpop.f32.mrb[136].mxu1  ;;  %v2188_v10 = vadd.f32 %v2187_v22, %v4414_v47 }
 0x278   : > { %2368 = vst [vmem:[%s4441_s11 + $0x58] sm:$0xff] %v2336_v20  ;;  %v2299_v54 = vadd.f32 %v2193_v34, %v4345_v44  ;;  %v2004_v40 = vpop.f32.mrb[137].mxu1 }
 0x279   : > { %2367 = vst [vmem:[%s4441_s11 + $0x50] sm:$0xff] %v2335_v25  ;;  %v2298_v16 = vadd.f32 %v2188_v10, %v4348_v4  ;;  %v2889_v21 = vpop.f32.mrb[110].mxu0 }
 0x27a   : > { %v2338_v51 = vadd.f32 %v4428_v43, %v2299_v54  ;;  %v2203_v42 = vadd.f32 %v2889_v21, %v4438_v56  ;;  %v2197_v0 = vpop.f32.mrb[111].mxu0 }
 0x27b   : > { %v2337_v23 = vadd.f32 %v4428_v43, %v2298_v16  ;;  %v2007_v49 = vpop.f32.mrb[138].mxu1  ;;  %v2198_v47 = vadd.f32 %v2197_v0, %v4430_v52 }
 0x27c   : > { %2370 = vst [vmem:[%s4441_s11 + $0x68] sm:$0xff] %v2338_v51  ;;  %v2301_v44 = vadd.f32 %v2203_v42, %v4353_v9  ;;  %v2009_v3 = vpop.f32.mrb[139].mxu1 }
 0x27d   : > { %2369 = vst [vmem:[%s4441_s11 + $0x60] sm:$0xff] %v2337_v23  ;;  %v2300_v4 = vadd.f32 %v2198_v47, %v4356_v5  ;;  %v2892_v27 = vpop.f32.mrb[112].mxu0 }
 0x27e   : > { %v2340_v28 = vadd.f32 %v4428_v43, %v2301_v44  ;;  %v2213_v13 = vadd.f32 %v2892_v27, %v1987_v15  ;;  %v2207_v56 = vpop.f32.mrb[113].mxu0 }
 0x27f   : > { %v2339_v26 = vadd.f32 %v4428_v43, %v2300_v4  ;;  %v2012_v35 = vpop.f32.mrb[140].mxu1  ;;  %v2208_v57 = vadd.f32 %v2207_v56, %v4450_v31 }
 0x280   : > { %2372 = vst [vmem:[%s4441_s11 + $0x78] sm:$0xff] %v2340_v28  ;;  %v2303_v52 = vadd.f32 %v2213_v13, %v4361_v53  ;;  %v2014_v9 = vpop.f32.mrb[141].mxu1 }
 0x281   : > { %2371 = vst [vmem:[%s4441_s11 + $0x70] sm:$0xff] %v2339_v26  ;;  %v2302_v29 = vadd.f32 %v2208_v57, %v4364_v1  ;;  %v2895_v5 = vpop.f32.mrb[114].mxu0 }
 0x282   : > { %v2342_v63 = vadd.f32 %v4428_v43, %v2303_v52  ;;  %v2223_v24 = vadd.f32 %v2895_v5, %v1997_v6  ;;  %v2217_v15 = vpop.f32.mrb[115].mxu0 }
 0x283   : > { %v2341_v38 = vadd.f32 %v4428_v43, %v2302_v29  ;;  %v2017_v32 = vpop.f32.mrb[142].mxu1  ;;  %v2218_v14 = vadd.f32 %v2217_v15, %v1992_v41 }
 0x284   : > { %2374 = vst [vmem:[%s4441_s11 + $0x88] sm:$0xff] %v2342_v63  ;;  %v2305_v31 = vadd.f32 %v2223_v24, %v4369_v50  ;;  %v2019_v39 = vpop.f32.mrb[143].mxu1 }
 0x285   : > { %2373 = vst [vmem:[%s4441_s11 + $0x80] sm:$0xff] %v2341_v38  ;;  %v2304_v53 = vadd.f32 %v2218_v14, %v4372_v36  ;;  %v2898_v11 = vpop.f32.mrb[116].mxu0 }
 0x286   : > { %v2344_v1 = vadd.f32 %v4428_v43, %v2305_v31  ;;  %v2233_v62 = vadd.f32 %v2898_v11, %v2007_v49  ;;  %v2227_v2 = vpop.f32.mrb[117].mxu0 }
 0x287   : > { %v2343_v6 = vadd.f32 %v4428_v43, %v2304_v53  ;;  %v2022_v17 = vpop.f32.mrb[144].mxu1  ;;  %v2228_v48 = vadd.f32 %v2227_v2, %v2002_v37 }
 0x288   : > { %2376 = vst [vmem:[%s4441_s11 + $0x98] sm:$0xff] %v2344_v1  ;;  %v2307_v41 = vadd.f32 %v2233_v62, %v4377_v12  ;;  %v2024_v59 = vpop.f32.mrb[145].mxu1 }
 0x289   : > { %2375 = vst [vmem:[%s4441_s11 + $0x90] sm:$0xff] %v2343_v6  ;;  %v2306_v50 = vadd.f32 %v2228_v48, %v4380_v46  ;;  %v2901_v7 = vpop.f32.mrb[118].mxu0 }
 0x28a   : > { %v2346_v36 = vadd.f32 %v4428_v43, %v2307_v41  ;;  %v2243_v20 = vadd.f32 %v2901_v7, %v2017_v32  ;;  %v2237_v34 = vpop.f32.mrb[119].mxu0 }
 0x28b   : > { %v2345_v22 = vadd.f32 %v4428_v43, %v2306_v50  ;;  %v2027_v25 = vpop.f32.mrb[146].mxu1  ;;  %v2238_v10 = vadd.f32 %v2237_v34, %v2012_v35 }
 0x28c   : > { %2378 = vst [vmem:[%s4441_s11 + $0xa8] sm:$0xff] %v2346_v36  ;;  %v2309_v37 = vadd.f32 %v2243_v20, %v4385_v33  ;;  %v2029_v54 = vpop.f32.mrb[147].mxu1 }
 0x28d   : > { %2377 = vst [vmem:[%s4441_s11 + $0xa0] sm:$0xff] %v2345_v22  ;;  %v2308_v12 = vadd.f32 %v2238_v10, %v4388_v30  ;;  %v2904_v40 = vpop.f32.mrb[120].mxu0 }
 0x28e   : > { %v2348_v46 = vadd.f32 %v4428_v43, %v2309_v37  ;;  %v2253_v16 = vadd.f32 %v2904_v40, %v2027_v25  ;;  %v2247_v21 = vpop.f32.mrb[121].mxu0 }
 0x28f   : > { %v2347_v51 = vadd.f32 %v4428_v43, %v2308_v12  ;;  %v2032_v42 = vpop.f32.mrb[148].mxu1  ;;  %v2248_v0 = vadd.f32 %v2247_v21, %v2022_v17 }
 0x290   : > { %2380 = vst [vmem:[%s4441_s11 + $0xb8] sm:$0xff] %v2348_v46  ;;  %v2311_v23 = vadd.f32 %v2253_v16, %v4393_v60  ;;  %v2034_v49 = vpop.f32.mrb[149].mxu1 }
 0x291   : > { %2379 = vst [vmem:[%s4441_s11 + $0xb0] sm:$0xff] %v2347_v51  ;;  %v2310_v33 = vadd.f32 %v2248_v0, %v4396_v45  ;;  %v2907_v47 = vpop.f32.mrb[122].mxu0 }
 0x292   : > { %v2350_v30 = vadd.f32 %v4428_v43, %v2311_v23  ;;  %v2257_v44 = vpop.f32.mrb[123].mxu0 }
 0x293   : > { %v2349_v3 = vadd.f32 %v4428_v43, %v2310_v33  ;;  %v2037_v4 = vpop.f32.mrb[150].mxu1  ;;  %v2258_v27 = vadd.f32 %v2257_v44, %v2032_v42 }
 0x294   : > { %2382 = vst [vmem:[%s4441_s11 + $0xc8] sm:$0xff] %v2350_v30  ;;  %v2263_v28 = vadd.f32 %v2907_v47, %v2037_v4  ;;  %v2039_v13 = vpop.f32.mrb[151].mxu1 }
 0x295   : > { %2381 = vst [vmem:[%s4441_s11 + $0xc0] sm:$0xff] %v2349_v3  ;;  %v2312_v60 = vadd.f32 %v2258_v27, %v4404_v18  ;;  %v2910_v56 = vpop.f32.mrb[124].mxu0 }
 0x296   : > { %v2313_v26 = vadd.f32 %v2263_v28, %v4401_v8  ;;  %v2267_v45 = vpop.f32.mrb[125].mxu0 }
 0x297   : > { %v2351_v35 = vadd.f32 %v4428_v43, %v2312_v60  ;;  %v2042_v57 = vpop.f32.mrb[152].mxu1 }
 0x298   : > { %v2352_v52 = vadd.f32 %v4428_v43, %v2313_v26  ;;  %v2268_v9 = vadd.f32 %v2267_v45, %v2042_v57  ;;  %v2044_v29 = vpop.f32.mrb[153].mxu1 }
 0x299   : > { %2383 = vst [vmem:[%s4441_s11 + $0xd0] sm:$0xff] %v2351_v35  ;;  %v2913_v5 = vpop.f32.mrb[126].mxu0 }
 0x29a   : > { %2384 = vst [vmem:[%s4441_s11 + $0xd8] sm:$0xff] %v2352_v52  ;;  %v2314_v18 = vadd.f32 %v2268_v9, %v4412_v58  ;;  %v2277_v63 = vpop.f32.mrb[127].mxu0 }
 0x29b   : > { %v2047_v24 = vpop.f32.mrb[154].mxu1 }
 0x29c   : > { %v2353_v8 = vadd.f32 %v4428_v43, %v2314_v18  ;;  %v2273_v15 = vadd.f32 %v2910_v56, %v2047_v24  ;;  %v2049_v38 = vpop.f32.mrb[155].mxu1 }
 0x29e   : > { %2385 = vst [vmem:[%s4441_s11 + $0xe0] sm:$0xff] %v2353_v8  ;;  %v2315_v32 = vadd.f32 %v2273_v15, %v4409_v19 }
 0x29f   : > { %v2052_v14 = vpop.f32.mrb[156].mxu1 }
 0x2a0   : > { %v2354_v31 = vadd.f32 %v4428_v43, %v2315_v32  ;;  %v2278_v39 = vadd.f32 %v2277_v63, %v2052_v14  ;;  %v2054_v53 = vpop.f32.mrb[157].mxu1 }
 0x2a2   : > { %2386 = vst [vmem:[%s4441_s11 + $0xe8] sm:$0xff] %v2354_v31  ;;  %v2316_v58 = vadd.f32 %v2278_v39, %v4420_v55 }
 0x2a3   : > { %v2057_v11 = vpop.f32.mrb[158].mxu1 }
 0x2a4   : > { %v2355_v1 = vadd.f32 %v4428_v43, %v2316_v58  ;;  %v2283_v62 = vadd.f32 %v2913_v5, %v2057_v11  ;;  %v2059_v19 = vpop.f32.mrb[159].mxu1 }
 0x2a6   : > { %2387 = vst [vmem:[%s4441_s11 + $0xf0] sm:$0xff] %v2355_v1  ;;  %v2317_v2 = vadd.f32 %v2283_v62, %v4417_v61 }
 0x2a8   : > { %v2356_v55 = vadd.f32 %v4428_v43, %v2317_v2 }
 0x2aa   : > { %2388 = vst [vmem:[%s4441_s11 + $0xf8] sm:$0xff] %v2356_v55 }
 0x2ab   : > { %3314 = shalt.err (!%p3311_p5)
}
 0x2ac   : > { %s3315_s5 = scalar_lea.hbm %s4554_s7, 4096  ;;  %s3319_s1 = scalar_lea.hbm %s4626_s3, 16384 }
 0x2ad   : > { %p3316_p8 = scmp.ne.s32.totalorder %s4554_s7, %s3315_s5  ;;  %p3320_p6 = scmp.lt.u32.totalorder %s4554_s7, %s4626_s3 }
 0x2ae   : > { %p3321_p10 = scmp.lt.u32.totalorder %s3319_s1, %s3315_s5  ;;  %p3323_p4 = scmp.lt.u32.totalorder %s3315_s5, %s4554_s7 }
 0x2af   : > { %p3317_p12 = pnand %p3316_p8, %p4656_p1 }
 0x2b0   : > { %p3322_p0 = por %p3321_p10, %p3320_p6 }
 0x2b1   : > { %p3318_p2 = pneg %p3317_p12 }
 0x2b2   : > { %p3324_p3 = por %p3323_p4, %p3322_p0 }
 0x2b4   : > { %p3325_p13 = pnand %p3324_p3, %p3318_p2 }
 0x2b6   : > { %3328 = shalt.err (!%p3325_p13)
}
 0x2b7   : > { %s3438_s23 = smov 128   ;;  %s3439_s24 = smov 8  }
 0x2b8   : > { %3095 = dma.vmem_to_hbm [thread:$0]  (%p4656_p1), %s4556_s18, 4096, %s4554_s7, %s4562_s15, %s3438_s23, %s3438_s23, %s3439_s24  }
 0x2b9 PF: > { %s4657_s20 = sld [smem:[#allocation12_spill]]  ;;  %s4658_s30 = sld [smem:[#allocation14_spill]] }
 0x2ba   : > { %p3117_p7 = scmp.ge.s32.totalorder %s3427_s22, 2 }
 0x2bf   : > { %s2420_s19 = sand.u32 1, %s4657_s20   ;;  %p4659_p9 = scmp.ne.s32.totalorder %s4658_s30, 0 }
 0x2c0   : > { %s2421_s26 = scalar_lea.sflag [#allocation4], %s2420_s19 }
 0x2c1   : > { %p3109_p11 = pnand %p3117_p7, %p4659_p9 }
 0x2c3   : > { %3382 = dma.done.wait (!%p3109_p11), %s2421_s26, 4096  }
 0x2c4   : > { %3384 = vsyncadd (!%p3109_p11), %s2421_s26, 4294963200  ;;  %s20_s22 = sadd.s32 1, %s3427_s22   ;;  %s4660_s18 = sld [smem:[#allocation13_spill]] }
 0x2c5   : > { %p17_p5 = scmp.ge.s32.totalorder %s20_s22, 6   ;;  %s4661_s20 = sld [smem:[#allocation15_spill]] }
 0x2c6   : > { %s4662_s12 = smov %s3391_s13  ;;  %s4663_s13 = smov %s3395_s14 }
 0x2c7   : > { %s4664_s14 = smov %s3636_s2  ;;  %s4665_s15 = smov %s3403_s16 }
 0x2c8   : > { %s4666_s16 = smov %s3407_s17  ;;  %s4667_s17 = smov %s3631_s29 }
 0x2c9   : > { %s4668_s19 = smov %s3423_s21  ;;  %s4669_s21 = smov %s4675_s10 }
 0x2ca   :  { %19 = sbr.rel (!%p17_p5) target bundleno = 13 (0xd), region = 90 }
 0x2d1   :  { %2426 = vsyncpa [#allocation3], 1 }
 0x2d2   :  { %2428 = vsyncpa [#allocation3 + $0x1], 1 }
 0x2d3   :  { %2429 = vsyncpa [#allocation6], 1 }
 0x2d4   :  { %2430 = vsyncpa [#allocation4], 1 }
 0x2d5   :  { %2432 = vsyncpa [#allocation4 + $0x1], 1 }

</bundles_post_ra>
